<compile_context>
chip_gen: v5e
topology: v5e:2x2
jax: 0.10.0
libtpu: 0.0.40
codegen_flags: <defaults>
</compile_context>

<pallas_src>
import functools

import jax
import jax.numpy as jnp
import numpy as np
from jax.experimental import pallas as pl
from jax.experimental.pallas import tpu as pltpu


def _roundup(x, m):
    return -(-x // m) * m


def _vf_g_gcn_kernel(coefficient, cheb_k, embed_dim, n_valid, n_core, tile_n,
                     mxu_dtype,
                     z_ref, h_ref, se_ref, emb_ref, w_in_ref, b_in_ref,
                     wp_ref, bias_n_ref, w_out_ref, b_out_ref,
                     out_ref, agc_ref):
    """Grid = (B, grid_n).

    z_ref    : (1, n8, hc)  f32         h_ref     : (1, n8, hc) f32 (h[..., 0])
    se_ref   : (n8, n8)     f32         emb_ref   : (n8, D)     f32
    w_in_ref : (hc, hhc)                b_in_ref  : (1, hhc)    f32
    wp_ref   : (D*K*hhc, hhc)           bias_n_ref: (n8, hhc)   f32 (= E @ BP)
    w_out_ref: (hhc, hc*hc)             b_out_ref : (1, hc*hc)  f32
    out_ref  : (1, tile_n, hc*hc)       agc_ref   : (ngrid, hhc) f32 VMEM scratch
    n_valid = N (true node count), n_core = roundup(N, 8) (stage-1 rows),
    ngrid = grid_n * tile_n >= n_core (stage-2 rows).
    """
    nt = pl.program_id(1)

    def mm(a, b):
        return jnp.dot(a.astype(mxu_dtype), b.astype(mxu_dtype),
                       preferred_element_type=jnp.float32)

    # ---- Stage 1: once per batch element, fill the (ngrid, hhc) agc scratch --
    @pl.when(nt == 0)
    def _stage1():
        z = z_ref[0]                      # (n8, hc)
        h = h_ref[0]                      # (n8, hc)

        # linear_in + relu -> (n8, hhc)
        z1 = jnp.maximum(mm(z, w_in_ref[...]) + b_in_ref[...], 0.0)

        # data-adaptive support: softmax(relu(h h^T), last dim).
        # Contract the last dim of both operands (no explicit transpose) and
        # keep the logits matmul in f32 even when mxu_dtype is bf16 (the
        # softmax/exp amplify rounding).
        logits = jax.lax.dot_general(h, h, (((1,), (1,)), ((), ())),
                                     preferred_element_type=jnp.float32)
        logits = jnp.maximum(logits, 0.0)
        if n_valid < n_core:              # mask padded columns
            cols = jax.lax.broadcasted_iota(jnp.int32, logits.shape, 1)
            logits = jnp.where(cols < n_valid, logits, -jnp.inf)
        m = jnp.max(logits, axis=-1, keepdims=True)
        e = jnp.exp(logits - m)
        sh = e / jnp.sum(e, axis=-1, keepdims=True)

        supports = coefficient * sh + (1.0 - coefficient) * se_ref[...]

        # Chebyshev recursion on propagated features (laplacian=False path):
        #   zg_0 = z1, zg_1 = S z1, zg_k = 2 S zg_{k-1} - zg_{k-2}
        zg_pm2 = z1
        zg_pm1 = mm(supports, z1)
        zg_list = [zg_pm2, zg_pm1]
        for _ in range(2, cheb_k):
            zg_new = 2.0 * mm(supports, zg_pm1) - zg_pm2
            zg_list.append(zg_new)
            zg_pm2, zg_pm1 = zg_pm1, zg_new
        zg_flat = jnp.concatenate(zg_list, axis=-1)           # (n8, K*hhc)

        # Fused node-adaptive parameter contraction: one big matmul instead of
        # D narrow ones.  X[n,(d,k,i)] = E[n,d] * zg_flat[n,(k,i)]
        emb = emb_ref[...]                                    # (n8, D)
        zgx = jnp.concatenate(
            [emb[:, d:d + 1] * zg_flat for d in range(embed_dim)], axis=-1)
        agc = bias_n_ref[...] + mm(zgx, wp_ref[...])          # (n8, hhc)

        if n_core == agc_ref.shape[0]:
            agc_ref[...] = agc
        else:
            agc_ref[0:n_core, :] = agc
            # rows >= n_core only feed boundary-clipped output rows; zero them
            # so stage 2 never computes on uninitialized VMEM.
            agc_ref[n_core:, :] = jnp.zeros(
                (agc_ref.shape[0] - n_core, agc.shape[1]), jnp.float32)

    # ---- Stage 2: every step: linear_out + tanh + lane-dense store ----------
    # (v5e note: with bf16 output the HBM store halves, so the single EUP slot
    # doing tile_n*hc*hc tanh's per step may become co-critical — check the
    # bundle before assuming the full 2x.)
    row = pl.multiple_of(nt * tile_n, tile_n)
    agc_tile = agc_ref[pl.ds(row, tile_n), :]                 # (tile_n, hhc)
    out = mm(agc_tile, w_out_ref[...]) + b_out_ref[...]       # (tile_n, hc*hc)
    out_ref[...] = jnp.tanh(out)[None].astype(out_ref.dtype)


def vector_field_g_gcn(z, h, params, *, coefficient, cheb_k, hidden_channels,
                       tile_n=None, mxu_dtype=None, out_dtype=None):
    B, N, hc = z.shape
    assert hc == hidden_channels
    assert cheb_k >= 2

    # Production shapes (hc >= 64) are HBM-writeback bound -> bf16 output and
    # bf16 MXU operands by default (f32 accumulation everywhere; the h.hT
    # logits matmul stays f32).  Small shapes default to f32 for exactness.
    if out_dtype is None:
        out_dtype = jnp.bfloat16 if hc >= 64 else jnp.float32
    if mxu_dtype is None:
        mxu_dtype = jnp.bfloat16 if hc >= 64 else jnp.float32

    z = z.astype(jnp.float32)
    h0 = h[..., 0].astype(jnp.float32)          # same slice as the module's agc()

    emb = params["node_embeddings"].astype(jnp.float32)       # (N, D)
    WP = params["weights_pool"]                               # (D, K, hhc, hhc)
    BP = params["bias_pool"]                                  # (D, hhc)
    D, K, hhc, _ = WP.shape
    assert K == cheb_k

    w_in = params["w_in"].astype(mxu_dtype)                   # (hc, hhc)
    b_in = params["b_in"].reshape(1, hhc).astype(jnp.float32)
    w_out = params["w_out"].astype(mxu_dtype)                 # (hhc, hc*hc)
    b_out = params["b_out"].reshape(1, hc * hc).astype(jnp.float32)
    wp = WP.reshape(D * K * hhc, hhc).astype(mxu_dtype)       # (D*K*hhc, hhc)

    # Batch-invariant precompute, hoisted out of the kernel.
    se = jax.nn.softmax(jax.nn.relu(emb @ emb.T), axis=-1)    # (N, N)
    bias_n = emb @ BP.astype(jnp.float32)                     # (N, hhc)

    # Device VMEM capacity: v5e/v6e 128 MiB, v7x 64 MiB.
    try:
        vmem_cap = int(pltpu.get_tpu_info().vmem_capacity_bytes)
    except Exception:
        vmem_cap = 64 * 2 ** 20

    # Stage-2 output tile: 128 rows by default, 256 on 128-MiB-VMEM chips.
    if tile_n is None:
        base = 256 if vmem_cap >= 96 * 2 ** 20 else 128
        tile_n = min(base, _roundup(N, 8))
    tile_n = max(8, _roundup(int(tile_n), 8))

    # Stage-1 working size (pad N to 8) is decoupled from stage-2 tiling so a
    # big output tile never inflates the N^2 stage-1 matmuls.
    n8 = _roundup(N, 8)
    grid_n = pl.cdiv(N, tile_n)
    ngrid = grid_n * tile_n                                   # scratch rows

    pad = n8 - N
    if pad:
        z = jnp.pad(z, ((0, 0), (0, pad), (0, 0)))
        h0 = jnp.pad(h0, ((0, 0), (0, pad), (0, 0)))
        se = jnp.pad(se, ((0, pad), (0, pad)))
        emb_p = jnp.pad(emb, ((0, pad), (0, 0)))
        bias_n = jnp.pad(bias_n, ((0, pad), (0, 0)))
    else:
        emb_p = emb

    # Rough VMEM budget, clamped to the physical capacity minus headroom.
    f32b = 4
    wb = jnp.dtype(mxu_dtype).itemsize
    ob = jnp.dtype(out_dtype).itemsize
    invariant = (n8 * n8 * f32b + n8 * D * f32b + hc * hhc * wb + hhc * f32b
                 + D * K * hhc * hhc * wb + n8 * hhc * f32b
                 + hhc * hc * hc * wb + hc * hc * f32b)
    est = (2 * 2 * n8 * hc * f32b                    # z, h (double-buffered)
           + 2 * invariant                           # worst case (fallback path)
           + ngrid * hhc * f32b                      # agc scratch
           + 5 * n8 * n8 * f32b                      # stage-1 N^2 temps
           + (K + 2) * n8 * hhc * f32b               # zg chain
           + n8 * D * K * hhc * f32b                 # fused-contraction operand
           + 2 * 2 * tile_n * hc * hc * max(ob, f32b))   # output tiles + f32 temp
    vmem_limit = int(min(vmem_cap - 8 * 2 ** 20, max(32 * 2 ** 20, 2 * est)))
    vmem_limit = max(vmem_limit, 16 * 2 ** 20)

    kernel = functools.partial(
        _vf_g_gcn_kernel, float(coefficient), int(cheb_k), int(D),
        int(N), int(n8), int(tile_n), mxu_dtype)

    def launch(single_buffer_invariants, padded_output):
        def inv(shape):
            nd = len(shape)
            idx = lambda b, n, _nd=nd: (0,) * _nd
            if single_buffer_invariants:
                # Batch-invariant operands: DMA'd once, keep a single buffer.
                return pl.BlockSpec(shape, idx, pipeline_mode=pl.Buffered(1))
            return pl.BlockSpec(shape, idx)

        n_out = ngrid if padded_output else N
        out = pl.pallas_call(
            kernel,
            out_shape=jax.ShapeDtypeStruct((B, n_out, hc * hc), out_dtype),
            grid=(B, grid_n),
            in_specs=[
                pl.BlockSpec((1, n8, hc), lambda b, n: (b, 0, 0)),   # z
                pl.BlockSpec((1, n8, hc), lambda b, n: (b, 0, 0)),   # h[..., 0]
                inv((n8, n8)),                                       # softmax(relu(E E^T))
                inv((n8, D)),                                        # node embeddings
                inv((hc, hhc)),                                      # w_in
                inv((1, hhc)),                                       # b_in
                inv((D * K * hhc, hhc)),                             # weights_pool (flat)
                inv((n8, hhc)),                                      # E @ bias_pool
                inv((hhc, hc * hc)),                                 # w_out
                inv((1, hc * hc)),                                   # b_out
            ],
            out_specs=pl.BlockSpec((1, tile_n, hc * hc), lambda b, n: (b, n, 0)),
            scratch_shapes=[pltpu.VMEM((ngrid, hhc), jnp.float32)],
            compiler_params=pltpu.CompilerParams(
                dimension_semantics=("parallel", "arbitrary"),
                vmem_limit_bytes=vmem_limit),
        )(z, h0, se, emb_p, w_in, b_in, wp, bias_n, w_out, b_out)
        if padded_output and n_out != N:
            out = out[:, :N]
        return out

    try:
        # Preferred path: single-buffered invariants + boundary-clipped output
        # (no post-kernel full-array slice copy).
        out = launch(True, False)
    except Exception:
        # Conservative fallback for older jax: default double-buffering and a
        # padded output followed by a slice.
        out = launch(False, True)

    return out.reshape(B, N, hc, hc)   # free metadata view, done in the wrapper


def reference_forward(z, h, params, *, coefficient, cheb_k, hidden_channels):
    """Pure-JAX transcription of the PyTorch forward, for verification."""
    w_in, b_in = params["w_in"], params["b_in"]
    w_out, b_out = params["w_out"], params["b_out"]
    E, WP, BP = params["node_embeddings"], params["weights_pool"], params["bias_pool"]

    z1 = jax.nn.relu(z @ w_in + b_in)
    h0 = h[..., 0]
    N = h0.shape[1]

    se = jax.nn.softmax(jax.nn.relu(E @ E.T), axis=1)
    sh = jax.nn.softmax(jax.nn.relu(jnp.einsum("bnc,bmc->bnm", h0, h0)), axis=2)
    supports = coefficient * sh + (1.0 - coefficient) * se

    eye = jnp.broadcast_to(jnp.eye(N, dtype=z.dtype), (z.shape[0], N, N))
    support_set = [eye, supports]
    for _ in range(2, cheb_k):
        support_set.append(2.0 * jnp.matmul(supports, support_set[-1]) - support_set[-2])

    zg = jnp.stack([jnp.matmul(s, z1) for s in support_set], axis=0)  # (K,B,N,hhc)
    zg = jnp.transpose(zg, (1, 2, 0, 3))                              # (B,N,K,hhc)
    weights = jnp.einsum("nd,dkio->nkio", E, WP)
    bias = E @ BP
    zg = jnp.einsum("bnki,nkio->bno", zg, weights) + bias

    out = zg @ w_out + b_out
    out = out.reshape(*zg.shape[:-1], hidden_channels, hidden_channels)
    return jnp.tanh(out)


if __name__ == "__main__":
    # Small shapes consistent with the module (original is B=64, N=307, hc=128).
    def make_inputs(key, B, N, input_channels, hc, hhc, cheb_k, embed_dim):
        ks = jax.random.split(key, 9)
        z = jax.random.normal(ks[0], (B, N, hc), jnp.float32)
        h = jax.random.normal(ks[1], (B, N, hc, input_channels), jnp.float32)
        params = {
            "w_in": jax.random.normal(ks[2], (hc, hhc), jnp.float32) * 0.5,
            "b_in": jax.random.normal(ks[3], (hhc,), jnp.float32) * 0.1,
            "w_out": jax.random.normal(ks[4], (hhc, hc * hc), jnp.float32) * 0.5,
            "b_out": jax.random.normal(ks[5], (hc * hc,), jnp.float32) * 0.1,
            "node_embeddings": jax.random.normal(ks[6], (N, embed_dim), jnp.float32),
            "weights_pool": jax.random.normal(
                ks[7], (embed_dim, cheb_k, hhc, hhc), jnp.float32) * 0.3,
            "bias_pool": jax.random.normal(ks[8], (embed_dim, hhc), jnp.float32) * 0.1,
        }
        return z, h, params

    coefficient, cheb_k, hc, hhc, embed_dim, Cin = 0.5, 3, 4, 8, 4, 2
    key = jax.random.PRNGKey(0)
    k1, k2 = jax.random.split(key)

    # --- config 1: multiple N-tiles, N divisible by tile, f32 (exact path) ---
    z, h, params = make_inputs(k1, 2, 32, Cin, hc, hhc, cheb_k, embed_dim)
    out = jax.block_until_ready(vector_field_g_gcn(
        z, h, params, coefficient=coefficient, cheb_k=cheb_k,
        hidden_channels=hc, tile_n=8))
    ref = reference_forward(z, h, params, coefficient=coefficient,
                            cheb_k=cheb_k, hidden_channels=hc)
    np.testing.assert_allclose(np.asarray(out), np.asarray(ref),
                               rtol=1e-4, atol=1e-4)

    # --- config 2: ragged N (stage-1 padding + softmax column mask + tail-zeroed
    #     scratch + boundary-clipped last output tile) ---
    z2, h2, params2 = make_inputs(k2, 2, 20, Cin, hc, hhc, cheb_k, embed_dim)
    out2 = jax.block_until_ready(vector_field_g_gcn(
        z2, h2, params2, coefficient=coefficient, cheb_k=cheb_k,
        hidden_channels=hc, tile_n=16))
    ref2 = reference_forward(z2, h2, params2, coefficient=coefficient,
                             cheb_k=cheb_k, hidden_channels=hc)
    np.testing.assert_allclose(np.asarray(out2), np.asarray(ref2),
                               rtol=1e-4, atol=1e-4)

    # --- config 3: production-style dtypes: bf16 MXU operands (f32 accumulation,
    #     f32 logits) + bf16 output (loose tolerance) ---
    out3 = jax.block_until_ready(vector_field_g_gcn(
        z, h, params, coefficient=coefficient, cheb_k=cheb_k, hidden_channels=hc,
        tile_n=8, mxu_dtype=jnp.bfloat16, out_dtype=jnp.bfloat16))
    np.testing.assert_allclose(np.asarray(out3.astype(jnp.float32)), np.asarray(ref),
                               rtol=0.0, atol=0.3)

    print("KERNEL_OK")
</pallas_src>

<mosaic_0001>
module attributes {stable_mosaic.version = 11 : i64} {
  func.func @_vf_g_gcn_kernel(%arg0: i32, %arg1: i32, %arg2: memref<1x32x4xf32, #tpu.memory_space<vmem>>, %arg3: memref<1x32x4xf32, #tpu.memory_space<vmem>>, %arg4: memref<32x32xf32, #tpu.memory_space<vmem>>, %arg5: memref<32x4xf32, #tpu.memory_space<vmem>>, %arg6: memref<4x8xf32, #tpu.memory_space<vmem>>, %arg7: memref<1x8xf32, #tpu.memory_space<vmem>>, %arg8: memref<96x8xf32, #tpu.memory_space<vmem>>, %arg9: memref<32x8xf32, #tpu.memory_space<vmem>>, %arg10: memref<8x16xf32, #tpu.memory_space<vmem>>, %arg11: memref<1x16xf32, #tpu.memory_space<vmem>>, %arg12: memref<1x8x16xf32, #tpu.memory_space<vmem>>, %arg13: memref<32x8xf32, #tpu.memory_space<vmem>>) attributes {dimension_semantics = [#tpu.dimension_semantics<parallel>, #tpu.dimension_semantics<arbitrary>], iteration_bounds = array<i64: 2, 4>, scalar_prefetch = 0 : i64, scratch_operands = 1 : i64, tpu.core_type = #tpu.core_type<tc>, window_params = [{transform_indices = @transform_0, window_bounds = array<i64: 1, 32, 4>}, {transform_indices = @transform_1, window_bounds = array<i64: 1, 32, 4>}, {pipeline_mode = #tpu.pipeline_mode<synchronous>, transform_indices = @transform_2, window_bounds = array<i64: 32, 32>}, {pipeline_mode = #tpu.pipeline_mode<synchronous>, transform_indices = @transform_3, window_bounds = array<i64: 32, 4>}, {pipeline_mode = #tpu.pipeline_mode<synchronous>, transform_indices = @transform_4, window_bounds = array<i64: 4, 8>}, {pipeline_mode = #tpu.pipeline_mode<synchronous>, transform_indices = @transform_5, window_bounds = array<i64: 1, 8>}, {pipeline_mode = #tpu.pipeline_mode<synchronous>, transform_indices = @transform_6, window_bounds = array<i64: 96, 8>}, {pipeline_mode = #tpu.pipeline_mode<synchronous>, transform_indices = @transform_7, window_bounds = array<i64: 32, 8>}, {pipeline_mode = #tpu.pipeline_mode<synchronous>, transform_indices = @transform_8, window_bounds = array<i64: 8, 16>}, {pipeline_mode = #tpu.pipeline_mode<synchronous>, transform_indices = @transform_9, window_bounds = array<i64: 1, 16>}, {transform_indices = @transform_10, window_bounds = array<i64: 1, 8, 16>}]} {
    %c0_i32 = arith.constant 0 : i32
    %0 = arith.cmpi eq, %arg1, %c0_i32 : i32
    %1 = arith.extui %0 : i1 to i32
    %c0_i32_0 = arith.constant 0 : i32
    %2 = arith.cmpi ne, %1, %c0_i32_0 : i32
    scf.if %2 {
      %c0_8 = arith.constant 0 : index
      %c0_9 = arith.constant 0 : index
      %c0_10 = arith.constant 0 : index
      %15 = vector.load %arg2[%c0_8, %c0_9, %c0_10] : memref<1x32x4xf32, #tpu.memory_space<vmem>>, vector<1x32x4xf32>
      %16 = vector.shape_cast %15 : vector<1x32x4xf32> to vector<32x4xf32>
      %c0_11 = arith.constant 0 : index
      %c0_12 = arith.constant 0 : index
      %c0_13 = arith.constant 0 : index
      %17 = vector.load %arg3[%c0_11, %c0_12, %c0_13] : memref<1x32x4xf32, #tpu.memory_space<vmem>>, vector<1x32x4xf32>
      %18 = vector.shape_cast %17 : vector<1x32x4xf32> to vector<32x4xf32>
      %c0_14 = arith.constant 0 : index
      %c0_15 = arith.constant 0 : index
      %19 = vector.load %arg6[%c0_14, %c0_15] : memref<4x8xf32, #tpu.memory_space<vmem>>, vector<4x8xf32>
      %cst_16 = arith.constant dense<0.000000e+00> : vector<32x8xf32>
      %20 = tpu.matmul %16, %19, %cst_16 {dimension_numbers = #tpu.dot_dimension_numbers<[1], [0], [0], [1], [0, 0, 1, 1], [], []>} : vector<32x4xf32>, vector<4x8xf32>, vector<32x8xf32> -> vector<32x8xf32>
      %c0_17 = arith.constant 0 : index
      %c0_18 = arith.constant 0 : index
      %21 = vector.load %arg7[%c0_17, %c0_18] : memref<1x8xf32, #tpu.memory_space<vmem>>, vector<1x8xf32>
      %22 = vector.broadcast %21 : vector<1x8xf32> to vector<32x8xf32>
      %23 = arith.addf %20, %22 : vector<32x8xf32>
      %cst_19 = arith.constant 0.000000e+00 : f32
      %24 = vector.broadcast %cst_19 : f32 to vector<32x8xf32>
      %25 = arith.maximumf %23, %24 : vector<32x8xf32>
      %cst_20 = arith.constant dense<0.000000e+00> : vector<32x32xf32>
      %26 = tpu.matmul %18, %18, %cst_20 {dimension_numbers = #tpu.dot_dimension_numbers<[1], [1], [0], [0], [0, 0, 1, 0], [], []>} : vector<32x4xf32>, vector<32x4xf32>, vector<32x32xf32> -> vector<32x32xf32>
      %cst_21 = arith.constant 0.000000e+00 : f32
      %27 = vector.broadcast %cst_21 : f32 to vector<32x32xf32>
      %28 = arith.maximumf %26, %27 : vector<32x32xf32>
      %cst_22 = arith.constant dense<0xFF800000> : vector<32xf32>
      %29 = vector.multi_reduction <maximumf>, %28, %cst_22 [1] : vector<32x32xf32> to vector<32xf32>
      %30 = vector.shape_cast %29 : vector<32xf32> to vector<32x1xf32>
      %31 = vector.broadcast %30 : vector<32x1xf32> to vector<32x32xf32>
      %32 = arith.subf %28, %31 : vector<32x32xf32>
      %33 = math.exp %32 : vector<32x32xf32>
      %cst_23 = arith.constant dense<0.000000e+00> : vector<32xf32>
      %34 = vector.multi_reduction <add>, %33, %cst_23 [1] : vector<32x32xf32> to vector<32xf32>
      %35 = vector.shape_cast %34 : vector<32xf32> to vector<32x1xf32>
      %36 = vector.broadcast %35 : vector<32x1xf32> to vector<32x32xf32>
      %37 = arith.divf %33, %36 : vector<32x32xf32>
      %cst_24 = arith.constant 5.000000e-01 : f32
      %38 = vector.broadcast %cst_24 : f32 to vector<32x32xf32>
      %39 = arith.mulf %38, %37 : vector<32x32xf32>
      %c0_25 = arith.constant 0 : index
      %c0_26 = arith.constant 0 : index
      %40 = vector.load %arg4[%c0_25, %c0_26] : memref<32x32xf32, #tpu.memory_space<vmem>>, vector<32x32xf32>
      %cst_27 = arith.constant 5.000000e-01 : f32
      %41 = vector.broadcast %cst_27 : f32 to vector<32x32xf32>
      %42 = arith.mulf %41, %40 : vector<32x32xf32>
      %43 = arith.addf %39, %42 : vector<32x32xf32>
      %cst_28 = arith.constant dense<0.000000e+00> : vector<32x8xf32>
      %44 = tpu.matmul %43, %25, %cst_28 {dimension_numbers = #tpu.dot_dimension_numbers<[1], [0], [0], [1], [0, 0, 1, 1], [], []>} : vector<32x32xf32>, vector<32x8xf32>, vector<32x8xf32> -> vector<32x8xf32>
      %cst_29 = arith.constant dense<0.000000e+00> : vector<32x8xf32>
      %45 = tpu.matmul %43, %44, %cst_29 {dimension_numbers = #tpu.dot_dimension_numbers<[1], [0], [0], [1], [0, 0, 1, 1], [], []>} : vector<32x32xf32>, vector<32x8xf32>, vector<32x8xf32> -> vector<32x8xf32>
      %cst_30 = arith.constant 2.000000e+00 : f32
      %46 = vector.broadcast %cst_30 : f32 to vector<32x8xf32>
      %47 = arith.mulf %46, %45 : vector<32x8xf32>
      %48 = arith.subf %47, %25 : vector<32x8xf32>
      %49 = tpu.concatenate %25, %44, %48 in 1 : vector<32x8xf32>, vector<32x8xf32>, vector<32x8xf32> -> vector<32x24xf32>
      %c0_31 = arith.constant 0 : index
      %c0_32 = arith.constant 0 : index
      %50 = vector.load %arg5[%c0_31, %c0_32] : memref<32x4xf32, #tpu.memory_space<vmem>>, vector<32x4xf32>
      %51 = vector.extract_strided_slice %50 {offsets = [0, 0], sizes = [32, 1], strides = [1, 1]} : vector<32x4xf32> to vector<32x1xf32>
      %52 = vector.broadcast %51 : vector<32x1xf32> to vector<32x24xf32>
      %53 = arith.mulf %52, %49 : vector<32x24xf32>
      %54 = vector.extract_strided_slice %50 {offsets = [0, 1], sizes = [32, 1], strides = [1, 1]} : vector<32x4xf32> to vector<32x1xf32>
      %55 = vector.broadcast %54 : vector<32x1xf32> to vector<32x24xf32>
      %56 = arith.mulf %55, %49 : vector<32x24xf32>
      %57 = vector.extract_strided_slice %50 {offsets = [0, 2], sizes = [32, 1], strides = [1, 1]} : vector<32x4xf32> to vector<32x1xf32>
      %58 = vector.broadcast %57 : vector<32x1xf32> to vector<32x24xf32>
      %59 = arith.mulf %58, %49 : vector<32x24xf32>
      %60 = vector.extract_strided_slice %50 {offsets = [0, 3], sizes = [32, 1], strides = [1, 1]} : vector<32x4xf32> to vector<32x1xf32>
      %61 = vector.broadcast %60 : vector<32x1xf32> to vector<32x24xf32>
      %62 = arith.mulf %61, %49 : vector<32x24xf32>
      %63 = tpu.concatenate %53, %56, %59, %62 in 1 : vector<32x24xf32>, vector<32x24xf32>, vector<32x24xf32>, vector<32x24xf32> -> vector<32x96xf32>
      %c0_33 = arith.constant 0 : index
      %c0_34 = arith.constant 0 : index
      %64 = vector.load %arg9[%c0_33, %c0_34] : memref<32x8xf32, #tpu.memory_space<vmem>>, vector<32x8xf32>
      %c0_35 = arith.constant 0 : index
      %c0_36 = arith.constant 0 : index
      %65 = vector.load %arg8[%c0_35, %c0_36] : memref<96x8xf32, #tpu.memory_space<vmem>>, vector<96x8xf32>
      %cst_37 = arith.constant dense<0.000000e+00> : vector<32x8xf32>
      %66 = tpu.matmul %63, %65, %cst_37 {dimension_numbers = #tpu.dot_dimension_numbers<[1], [0], [0], [1], [0, 0, 1, 1], [], []>} : vector<32x96xf32>, vector<96x8xf32>, vector<32x8xf32> -> vector<32x8xf32>
      %67 = arith.addf %64, %66 : vector<32x8xf32>
      %c0_38 = arith.constant 0 : index
      %c0_39 = arith.constant 0 : index
      %68 = vector.load %arg13[%c0_38, %c0_39] : memref<32x8xf32, #tpu.memory_space<vmem>>, vector<32x8xf32>
      tpu.vector_store %arg13[%c0_38, %c0_39], %67 {strides = array<i32>} : memref<32x8xf32, #tpu.memory_space<vmem>>, vector<32x8xf32>,
    } else {
    }
    %c8_i32 = arith.constant 8 : i32
    %3 = arith.muli %arg1, %c8_i32 : i32
    %4 = tpu.assume_multiple %3, 8 : i32
    %5 = arith.index_cast %4 : i32 to index
    %c0 = arith.constant 0 : index
    %6 = vector.load %arg13[%5, %c0] : memref<32x8xf32, #tpu.memory_space<vmem>>, vector<8x8xf32>
    %c0_1 = arith.constant 0 : index
    %c0_2 = arith.constant 0 : index
    %7 = vector.load %arg10[%c0_1, %c0_2] : memref<8x16xf32, #tpu.memory_space<vmem>>, vector<8x16xf32>
    %cst = arith.constant dense<0.000000e+00> : vector<8x16xf32>
    %8 = tpu.matmul %6, %7, %cst {dimension_numbers = #tpu.dot_dimension_numbers<[1], [0], [0], [1], [0, 0, 1, 1], [], []>} : vector<8x8xf32>, vector<8x16xf32>, vector<8x16xf32> -> vector<8x16xf32>
    %c0_3 = arith.constant 0 : index
    %c0_4 = arith.constant 0 : index
    %9 = vector.load %arg11[%c0_3, %c0_4] : memref<1x16xf32, #tpu.memory_space<vmem>>, vector<1x16xf32>
    %10 = vector.broadcast %9 : vector<1x16xf32> to vector<8x16xf32>
    %11 = arith.addf %8, %10 : vector<8x16xf32>
    %12 = math.tanh %11 : vector<8x16xf32>
    %13 = vector.shape_cast %12 : vector<8x16xf32> to vector<1x8x16xf32>
    %c0_5 = arith.constant 0 : index
    %c0_6 = arith.constant 0 : index
    %c0_7 = arith.constant 0 : index
    %14 = vector.load %arg12[%c0_5, %c0_6, %c0_7] : memref<1x8x16xf32, #tpu.memory_space<vmem>>, vector<1x8x16xf32>
    tpu.vector_store %arg12[%c0_5, %c0_6, %c0_7], %13 {strides = array<i32>} : memref<1x8x16xf32, #tpu.memory_space<vmem>>, vector<1x8x16xf32>,
    return
  }
  func.func @transform_0(%arg0: i32, %arg1: i32) -> (i32, i32, i32) {
    %c0_i32 = arith.constant 0 : i32
    %c0_i32_0 = arith.constant 0 : i32
    %c0_i32_1 = arith.constant 0 : i32
    return %arg0, %c0_i32, %c0_i32_0 : i32, i32, i32
  }
  func.func @transform_1(%arg0: i32, %arg1: i32) -> (i32, i32, i32) {
    %c0_i32 = arith.constant 0 : i32
    %c0_i32_0 = arith.constant 0 : i32
    %c0_i32_1 = arith.constant 0 : i32
    return %arg0, %c0_i32, %c0_i32_0 : i32, i32, i32
  }
  func.func @transform_2(%arg0: i32, %arg1: i32) -> (i32, i32) {
    %c0_i32 = arith.constant 0 : i32
    %c0_i32_0 = arith.constant 0 : i32
    %c0_i32_1 = arith.constant 0 : i32
    return %c0_i32, %c0_i32_0 : i32, i32
  }
  func.func @transform_3(%arg0: i32, %arg1: i32) -> (i32, i32) {
    %c0_i32 = arith.constant 0 : i32
    %c0_i32_0 = arith.constant 0 : i32
    %c0_i32_1 = arith.constant 0 : i32
    return %c0_i32, %c0_i32_0 : i32, i32
  }
  func.func @transform_4(%arg0: i32, %arg1: i32) -> (i32, i32) {
    %c0_i32 = arith.constant 0 : i32
    %c0_i32_0 = arith.constant 0 : i32
    %c0_i32_1 = arith.constant 0 : i32
    return %c0_i32, %c0_i32_0 : i32, i32
  }
  func.func @transform_5(%arg0: i32, %arg1: i32) -> (i32, i32) {
    %c0_i32 = arith.constant 0 : i32
    %c0_i32_0 = arith.constant 0 : i32
    %c0_i32_1 = arith.constant 0 : i32
    return %c0_i32, %c0_i32_0 : i32, i32
  }
  func.func @transform_6(%arg0: i32, %arg1: i32) -> (i32, i32) {
    %c0_i32 = arith.constant 0 : i32
    %c0_i32_0 = arith.constant 0 : i32
    %c0_i32_1 = arith.constant 0 : i32
    return %c0_i32, %c0_i32_0 : i32, i32
  }
  func.func @transform_7(%arg0: i32, %arg1: i32) -> (i32, i32) {
    %c0_i32 = arith.constant 0 : i32
    %c0_i32_0 = arith.constant 0 : i32
    %c0_i32_1 = arith.constant 0 : i32
    return %c0_i32, %c0_i32_0 : i32, i32
  }
  func.func @transform_8(%arg0: i32, %arg1: i32) -> (i32, i32) {
    %c0_i32 = arith.constant 0 : i32
    %c0_i32_0 = arith.constant 0 : i32
    %c0_i32_1 = arith.constant 0 : i32
    return %c0_i32, %c0_i32_0 : i32, i32
  }
  func.func @transform_9(%arg0: i32, %arg1: i32) -> (i32, i32) {
    %c0_i32 = arith.constant 0 : i32
    %c0_i32_0 = arith.constant 0 : i32
    %c0_i32_1 = arith.constant 0 : i32
    return %c0_i32, %c0_i32_0 : i32, i32
  }
  func.func @transform_10(%arg0: i32, %arg1: i32) -> (i32, i32, i32) {
    %c0_i32 = arith.constant 0 : i32
    %c0_i32_0 = arith.constant 0 : i32
    return %arg0, %arg1, %c0_i32 : i32, i32, i32
  }
}

module attributes {stable_mosaic.version = 11 : i64} {
  func.func @_vf_g_gcn_kernel(%arg0: i32, %arg1: i32, %arg2: memref<1x32x4xf32, #tpu.memory_space<vmem>>, %arg3: memref<1x32x4xf32, #tpu.memory_space<vmem>>, %arg4: memref<32x32xf32, #tpu.memory_space<vmem>>, %arg5: memref<32x4xf32, #tpu.memory_space<vmem>>, %arg6: memref<4x8xf32, #tpu.memory_space<vmem>>, %arg7: memref<1x8xf32, #tpu.memory_space<vmem>>, %arg8: memref<96x8xf32, #tpu.memory_space<vmem>>, %arg9: memref<32x8xf32, #tpu.memory_space<vmem>>, %arg10: memref<8x16xf32, #tpu.memory_space<vmem>>, %arg11: memref<1x16xf32, #tpu.memory_space<vmem>>, %arg12: memref<1x8x16xf32, #tpu.memory_space<vmem>>, %arg13: memref<32x8xf32, #tpu.memory_space<vmem>>) attributes {dimension_semantics = [#tpu.dimension_semantics<parallel>, #tpu.dimension_semantics<arbitrary>], iteration_bounds = array<i64: 2, 4>, scalar_prefetch = 0 : i64, scratch_operands = 1 : i64, tpu.core_type = #tpu.core_type<tc>, window_params = [{transform_indices = @transform_0, window_bounds = array<i64: 1, 32, 4>}, {transform_indices = @transform_1, window_bounds = array<i64: 1, 32, 4>}, {pipeline_mode = #tpu.pipeline_mode<synchronous>, transform_indices = @transform_2, window_bounds = array<i64: 32, 32>}, {pipeline_mode = #tpu.pipeline_mode<synchronous>, transform_indices = @transform_3, window_bounds = array<i64: 32, 4>}, {pipeline_mode = #tpu.pipeline_mode<synchronous>, transform_indices = @transform_4, window_bounds = array<i64: 4, 8>}, {pipeline_mode = #tpu.pipeline_mode<synchronous>, transform_indices = @transform_5, window_bounds = array<i64: 1, 8>}, {pipeline_mode = #tpu.pipeline_mode<synchronous>, transform_indices = @transform_6, window_bounds = array<i64: 96, 8>}, {pipeline_mode = #tpu.pipeline_mode<synchronous>, transform_indices = @transform_7, window_bounds = array<i64: 32, 8>}, {pipeline_mode = #tpu.pipeline_mode<synchronous>, transform_indices = @transform_8, window_bounds = array<i64: 8, 16>}, {pipeline_mode = #tpu.pipeline_mode<synchronous>, transform_indices = @transform_9, window_bounds = array<i64: 1, 16>}, {transform_indices = @transform_10, window_bounds = array<i64: 1, 8, 16>}]} {
    %c0_i32 = arith.constant 0 : i32
    %0 = arith.cmpi eq, %arg1, %c0_i32 : i32
    %1 = arith.extui %0 : i1 to i32
    %c0_i32_0 = arith.constant 0 : i32
    %2 = arith.cmpi ne, %1, %c0_i32_0 : i32
    scf.if %2 {
      %c0_8 = arith.constant 0 : index
      %c0_9 = arith.constant 0 : index
      %c0_10 = arith.constant 0 : index
      %15 = vector.load %arg2[%c0_8, %c0_9, %c0_10] : memref<1x32x4xf32, #tpu.memory_space<vmem>>, vector<1x32x4xf32>
      %16 = vector.shape_cast %15 : vector<1x32x4xf32> to vector<32x4xf32>
      %c0_11 = arith.constant 0 : index
      %c0_12 = arith.constant 0 : index
      %c0_13 = arith.constant 0 : index
      %17 = vector.load %arg3[%c0_11, %c0_12, %c0_13] : memref<1x32x4xf32, #tpu.memory_space<vmem>>, vector<1x32x4xf32>
      %18 = vector.shape_cast %17 : vector<1x32x4xf32> to vector<32x4xf32>
      %c0_14 = arith.constant 0 : index
      %c0_15 = arith.constant 0 : index
      %19 = vector.load %arg6[%c0_14, %c0_15] : memref<4x8xf32, #tpu.memory_space<vmem>>, vector<4x8xf32>
      %cst_16 = arith.constant dense<0.000000e+00> : vector<32x8xf32>
      %20 = tpu.matmul %16, %19, %cst_16 {dimension_numbers = #tpu.dot_dimension_numbers<[1], [0], [0], [1], [0, 0, 1, 1], [], []>} : vector<32x4xf32>, vector<4x8xf32>, vector<32x8xf32> -> vector<32x8xf32>
      %c0_17 = arith.constant 0 : index
      %c0_18 = arith.constant 0 : index
      %21 = vector.load %arg7[%c0_17, %c0_18] : memref<1x8xf32, #tpu.memory_space<vmem>>, vector<1x8xf32>
      %22 = vector.broadcast %21 : vector<1x8xf32> to vector<32x8xf32>
      %23 = arith.addf %20, %22 : vector<32x8xf32>
      %cst_19 = arith.constant 0.000000e+00 : f32
      %24 = vector.broadcast %cst_19 : f32 to vector<32x8xf32>
      %25 = arith.maximumf %23, %24 : vector<32x8xf32>
      %cst_20 = arith.constant dense<0.000000e+00> : vector<32x32xf32>
      %26 = tpu.matmul %18, %18, %cst_20 {dimension_numbers = #tpu.dot_dimension_numbers<[1], [1], [0], [0], [0, 0, 1, 0], [], []>} : vector<32x4xf32>, vector<32x4xf32>, vector<32x32xf32> -> vector<32x32xf32>
      %cst_21 = arith.constant 0.000000e+00 : f32
      %27 = vector.broadcast %cst_21 : f32 to vector<32x32xf32>
      %28 = arith.maximumf %26, %27 : vector<32x32xf32>
      %cst_22 = arith.constant dense<0xFF800000> : vector<32xf32>
      %29 = vector.multi_reduction <maximumf>, %28, %cst_22 [1] : vector<32x32xf32> to vector<32xf32>
      %30 = vector.shape_cast %29 : vector<32xf32> to vector<32x1xf32>
      %31 = vector.broadcast %30 : vector<32x1xf32> to vector<32x32xf32>
      %32 = arith.subf %28, %31 : vector<32x32xf32>
      %33 = math.exp %32 : vector<32x32xf32>
      %cst_23 = arith.constant dense<0.000000e+00> : vector<32xf32>
      %34 = vector.multi_reduction <add>, %33, %cst_23 [1] : vector<32x32xf32> to vector<32xf32>
      %35 = vector.shape_cast %34 : vector<32xf32> to vector<32x1xf32>
      %36 = vector.broadcast %35 : vector<32x1xf32> to vector<32x32xf32>
      %37 = arith.divf %33, %36 : vector<32x32xf32>
      %cst_24 = arith.constant 5.000000e-01 : f32
      %38 = vector.broadcast %cst_24 : f32 to vector<32x32xf32>
      %39 = arith.mulf %38, %37 : vector<32x32xf32>
      %c0_25 = arith.constant 0 : index
      %c0_26 = arith.constant 0 : index
      %40 = vector.load %arg4[%c0_25, %c0_26] : memref<32x32xf32, #tpu.memory_space<vmem>>, vector<32x32xf32>
      %cst_27 = arith.constant 5.000000e-01 : f32
      %41 = vector.broadcast %cst_27 : f32 to vector<32x32xf32>
      %42 = arith.mulf %41, %40 : vector<32x32xf32>
      %43 = arith.addf %39, %42 : vector<32x32xf32>
      %cst_28 = arith.constant dense<0.000000e+00> : vector<32x8xf32>
      %44 = tpu.matmul %43, %25, %cst_28 {dimension_numbers = #tpu.dot_dimension_numbers<[1], [0], [0], [1], [0, 0, 1, 1], [], []>} : vector<32x32xf32>, vector<32x8xf32>, vector<32x8xf32> -> vector<32x8xf32>
      %cst_29 = arith.constant dense<0.000000e+00> : vector<32x8xf32>
      %45 = tpu.matmul %43, %44, %cst_29 {dimension_numbers = #tpu.dot_dimension_numbers<[1], [0], [0], [1], [0, 0, 1, 1], [], []>} : vector<32x32xf32>, vector<32x8xf32>, vector<32x8xf32> -> vector<32x8xf32>
      %cst_30 = arith.constant 2.000000e+00 : f32
      %46 = vector.broadcast %cst_30 : f32 to vector<32x8xf32>
      %47 = arith.mulf %46, %45 : vector<32x8xf32>
      %48 = arith.subf %47, %25 : vector<32x8xf32>
      %49 = tpu.concatenate %25, %44, %48 in 1 : vector<32x8xf32>, vector<32x8xf32>, vector<32x8xf32> -> vector<32x24xf32>
      %c0_31 = arith.constant 0 : index
      %c0_32 = arith.constant 0 : index
      %50 = vector.load %arg5[%c0_31, %c0_32] : memref<32x4xf32, #tpu.memory_space<vmem>>, vector<32x4xf32>
      %51 = vector.extract_strided_slice %50 {offsets = [0, 0], sizes = [32, 1], strides = [1, 1]} : vector<32x4xf32> to vector<32x1xf32>
      %52 = vector.broadcast %51 : vector<32x1xf32> to vector<32x24xf32>
      %53 = arith.mulf %52, %49 : vector<32x24xf32>
      %54 = vector.extract_strided_slice %50 {offsets = [0, 1], sizes = [32, 1], strides = [1, 1]} : vector<32x4xf32> to vector<32x1xf32>
      %55 = vector.broadcast %54 : vector<32x1xf32> to vector<32x24xf32>
      %56 = arith.mulf %55, %49 : vector<32x24xf32>
      %57 = vector.extract_strided_slice %50 {offsets = [0, 2], sizes = [32, 1], strides = [1, 1]} : vector<32x4xf32> to vector<32x1xf32>
      %58 = vector.broadcast %57 : vector<32x1xf32> to vector<32x24xf32>
      %59 = arith.mulf %58, %49 : vector<32x24xf32>
      %60 = vector.extract_strided_slice %50 {offsets = [0, 3], sizes = [32, 1], strides = [1, 1]} : vector<32x4xf32> to vector<32x1xf32>
      %61 = vector.broadcast %60 : vector<32x1xf32> to vector<32x24xf32>
      %62 = arith.mulf %61, %49 : vector<32x24xf32>
      %63 = tpu.concatenate %53, %56, %59, %62 in 1 : vector<32x24xf32>, vector<32x24xf32>, vector<32x24xf32>, vector<32x24xf32> -> vector<32x96xf32>
      %c0_33 = arith.constant 0 : index
      %c0_34 = arith.constant 0 : index
      %64 = vector.load %arg9[%c0_33, %c0_34] : memref<32x8xf32, #tpu.memory_space<vmem>>, vector<32x8xf32>
      %c0_35 = arith.constant 0 : index
      %c0_36 = arith.constant 0 : index
      %65 = vector.load %arg8[%c0_35, %c0_36] : memref<96x8xf32, #tpu.memory_space<vmem>>, vector<96x8xf32>
      %cst_37 = arith.constant dense<0.000000e+00> : vector<32x8xf32>
      %66 = tpu.matmul %63, %65, %cst_37 {dimension_numbers = #tpu.dot_dimension_numbers<[1], [0], [0], [1], [0, 0, 1, 1], [], []>} : vector<32x96xf32>, vector<96x8xf32>, vector<32x8xf32> -> vector<32x8xf32>
      %67 = arith.addf %64, %66 : vector<32x8xf32>
      %c0_38 = arith.constant 0 : index
      %c0_39 = arith.constant 0 : index
      %68 = vector.load %arg13[%c0_38, %c0_39] : memref<32x8xf32, #tpu.memory_space<vmem>>, vector<32x8xf32>
      tpu.vector_store %arg13[%c0_38, %c0_39], %67 {strides = array<i32>} : memref<32x8xf32, #tpu.memory_space<vmem>>, vector<32x8xf32>,
    } else {
    }
    %c8_i32 = arith.constant 8 : i32
    %3 = arith.muli %arg1, %c8_i32 : i32
    %4 = tpu.assume_multiple %3, 8 : i32
    %5 = arith.index_cast %4 : i32 to index
    %c0 = arith.constant 0 : index
    %6 = vector.load %arg13[%5, %c0] : memref<32x8xf32, #tpu.memory_space<vmem>>, vector<8x8xf32>
    %c0_1 = arith.constant 0 : index
    %c0_2 = arith.constant 0 : index
    %7 = vector.load %arg10[%c0_1, %c0_2] : memref<8x16xf32, #tpu.memory_space<vmem>>, vector<8x16xf32>
    %cst = arith.constant dense<0.000000e+00> : vector<8x16xf32>
    %8 = tpu.matmul %6, %7, %cst {dimension_numbers = #tpu.dot_dimension_numbers<[1], [0], [0], [1], [0, 0, 1, 1], [], []>} : vector<8x8xf32>, vector<8x16xf32>, vector<8x16xf32> -> vector<8x16xf32>
    %c0_3 = arith.constant 0 : index
    %c0_4 = arith.constant 0 : index
    %9 = vector.load %arg11[%c0_3, %c0_4] : memref<1x16xf32, #tpu.memory_space<vmem>>, vector<1x16xf32>
    %10 = vector.broadcast %9 : vector<1x16xf32> to vector<8x16xf32>
    %11 = arith.addf %8, %10 : vector<8x16xf32>
    %12 = math.tanh %11 : vector<8x16xf32>
    %13 = vector.shape_cast %12 : vector<8x16xf32> to vector<1x8x16xf32>
    %c0_5 = arith.constant 0 : index
    %c0_6 = arith.constant 0 : index
    %c0_7 = arith.constant 0 : index
    %14 = vector.load %arg12[%c0_5, %c0_6, %c0_7] : memref<1x8x16xf32, #tpu.memory_space<vmem>>, vector<1x8x16xf32>
    tpu.vector_store %arg12[%c0_5, %c0_6, %c0_7], %13 {strides = array<i32>} : memref<1x8x16xf32, #tpu.memory_space<vmem>>, vector<1x8x16xf32>,
    return
  }
  func.func @transform_0(%arg0: i32, %arg1: i32) -> (i32, i32, i32) {
    %c0_i32 = arith.constant 0 : i32
    %c0_i32_0 = arith.constant 0 : i32
    %c0_i32_1 = arith.constant 0 : i32
    return %arg0, %c0_i32, %c0_i32_0 : i32, i32, i32
  }
  func.func @transform_1(%arg0: i32, %arg1: i32) -> (i32, i32, i32) {
    %c0_i32 = arith.constant 0 : i32
    %c0_i32_0 = arith.constant 0 : i32
    %c0_i32_1 = arith.constant 0 : i32
    return %arg0, %c0_i32, %c0_i32_0 : i32, i32, i32
  }
  func.func @transform_2(%arg0: i32, %arg1: i32) -> (i32, i32) {
    %c0_i32 = arith.constant 0 : i32
    %c0_i32_0 = arith.constant 0 : i32
    %c0_i32_1 = arith.constant 0 : i32
    return %c0_i32, %c0_i32_0 : i32, i32
  }
  func.func @transform_3(%arg0: i32, %arg1: i32) -> (i32, i32) {
    %c0_i32 = arith.constant 0 : i32
    %c0_i32_0 = arith.constant 0 : i32
    %c0_i32_1 = arith.constant 0 : i32
    return %c0_i32, %c0_i32_0 : i32, i32
  }
  func.func @transform_4(%arg0: i32, %arg1: i32) -> (i32, i32) {
    %c0_i32 = arith.constant 0 : i32
    %c0_i32_0 = arith.constant 0 : i32
    %c0_i32_1 = arith.constant 0 : i32
    return %c0_i32, %c0_i32_0 : i32, i32
  }
  func.func @transform_5(%arg0: i32, %arg1: i32) -> (i32, i32) {
    %c0_i32 = arith.constant 0 : i32
    %c0_i32_0 = arith.constant 0 : i32
    %c0_i32_1 = arith.constant 0 : i32
    return %c0_i32, %c0_i32_0 : i32, i32
  }
  func.func @transform_6(%arg0: i32, %arg1: i32) -> (i32, i32) {
    %c0_i32 = arith.constant 0 : i32
    %c0_i32_0 = arith.constant 0 : i32
    %c0_i32_1 = arith.constant 0 : i32
    return %c0_i32, %c0_i32_0 : i32, i32
  }
  func.func @transform_7(%arg0: i32, %arg1: i32) -> (i32, i32) {
    %c0_i32 = arith.constant 0 : i32
    %c0_i32_0 = arith.constant 0 : i32
    %c0_i32_1 = arith.constant 0 : i32
    return %c0_i32, %c0_i32_0 : i32, i32
  }
  func.func @transform_8(%arg0: i32, %arg1: i32) -> (i32, i32) {
    %c0_i32 = arith.constant 0 : i32
    %c0_i32_0 = arith.constant 0 : i32
    %c0_i32_1 = arith.constant 0 : i32
    return %c0_i32, %c0_i32_0 : i32, i32
  }
  func.func @transform_9(%arg0: i32, %arg1: i32) -> (i32, i32) {
    %c0_i32 = arith.constant 0 : i32
    %c0_i32_0 = arith.constant 0 : i32
    %c0_i32_1 = arith.constant 0 : i32
    return %c0_i32, %c0_i32_0 : i32, i32
  }
  func.func @transform_10(%arg0: i32, %arg1: i32) -> (i32, i32, i32) {
    %c0_i32 = arith.constant 0 : i32
    %c0_i32_0 = arith.constant 0 : i32
    return %arg0, %arg1, %c0_i32 : i32, i32, i32
  }
}

</mosaic_0001>

<bundles_post_ra>
// kernel: tpu_custom_call.1
= control target key start
LH: loop header
LB: loop body
LE: loop exit
PB: predicated region body
PF: predicated region fallthrough
CT: control target
= control target key end

     0   :  { %s1334_s13 = smov 0   ;;  %s1336_s14 = smov 0   ;;  %s1647_s0 = inlined_call_operand.vmem [shape: f32[2,32,4], index: 0, kind: input, shape index: {}]   ;;  %s1648_s1 = inlined_call_operand.vmem [shape: f32[2,32,4], index: 1, kind: input, shape index: {}]   ;;  %s1649_s2 = inlined_call_operand.vmem [shape: f32[32,32], index: 2, kind: input, shape index: {}]   ;;  %s1650_s3 = inlined_call_operand.vmem [shape: f32[32,4], index: 3, kind: input, shape index: {}]   ;;  %s1651_s4 = inlined_call_operand.vmem [shape: f32[4,8], index: 4, kind: input, shape index: {}]   ;;  %s1652_s5 = inlined_call_operand.vmem [shape: f32[1,8], index: 5, kind: input, shape index: {}]   ;;  %s1653_s6 = inlined_call_operand.vmem [shape: f32[96,8], index: 6, kind: input, shape index: {}]   ;;  %s1654_s7 = inlined_call_operand.vmem [shape: f32[32,8], index: 7, kind: input, shape index: {}]   ;;  %s1655_s8 = inlined_call_operand.vmem [shape: f32[8,16], index: 8, kind: input, shape index: {}]   ;;  %s1656_s9 = inlined_call_operand.vmem [shape: f32[1,16], index: 9, kind: input, shape index: {}]   ;;  %s1657_s10 = inlined_call_operand.vmem [shape: f32[2,32,16], index: 10, kind: output, shape index: {}]  }
   0x1   :  { %s1338_s15 = smov 0   ;;  %s1340_s16 = smov 0  }
   0x2   :  { %s1342_s17 = smov 0  }
   0x3 LB: > { %s29_s18 = sadd.s32 1, %s1260_s15  ;;  %s32_s19 = sadd.s32 1, %s1264_s16  ;;  %s1268_s17 = sphi %s1342_s17, %s20_s17   ;;  %s1264_s16 = sphi %s1340_s16, %s1663_s16   ;;  %s1260_s15 = sphi %s1338_s15, %s1662_s15   ;;  %s1256_s14 = sphi %s1336_s14, %s1661_s14   ;;  %s1252_s13 = sphi %s1334_s13, %s1660_s13  }
   0x4   : > { %p30_p0 = scmp.ge.s32.totalorder %s29_s18, 4  ;;  %p1095_p1 = scmp.ge.s32.totalorder %s1268_s17, 1 }
   0x5   : > { %p336_p2 = scmp.lt.s32.totalorder %s1268_s17, 9 }
   0x6   : > { %s1665_s18 = smov (%p30_p0, %s29_s18), 0  ;;  %s1667_s19 = smov (!%p30_p0, %s32_s19), %s1264_s16 }
   0x7   : > { %p337_p3 = pnand %p1095_p1, %p336_p2  ;;  %p34_p4 = scmp.ge.s32.totalorder %s1667_s19, 2 }
   0x8   : > { %p382_p5 = scmp.lt.s32.totalorder (!%p337_p3), %s1256_s14, 1  ;;  %p394_p6 = scmp.lt.s32.totalorder (!%p337_p3), %s1252_s13, 3 }
   0x9   : > { %s1669_s19 = smov (%p34_p4, %s1667_s19), 0  ;;  %340 = sbr.rel (%p337_p3) target bundleno = 1288 (0x508), region = 60 }
   0xa   : > { %1658 = sst [smem:[#allocation3_spill]] %s1669_s19  ;;  %p1102_p7 = scmp.ne.s32.totalorder (!%p337_p3), %s1252_s13, 0 }
   0xe   : > { %s1671_s14 = smov (!%p382_p5, %s1256_s14), 1  ;;  %s1272_s23 = smov (!%p1102_p7), 8  }
   0xf   : > { %s395_s20 = scalar_select %p394_p6, %s1252_s13, 3 }
  0x10   : > { %s1132_s21 = sshll.u32 %s1671_s14, 5  ;;  %s1100_s22 = sshll.u32 %s1671_s14, 2 }
  0x11   : > { %s1371_s25 = scalar_lea.vmem %s1647_s0, %s1132_s21  ;;  %s391_s28 = scalar_lea.vmem %s1648_s1, %s1132_s21 }
  0x12   : > { %s397_s29 = sadd.s32 %s1100_s22, %s395_s20  ;;  %403 = sbr.rel (%p1102_p7) target bundleno = 1145 (0x479), region = 64 }
  0x13   : > { %s1101_s30 = sshll.u32 %s397_s29, 3  ;;  %s1274_s24 = smov (!%p1102_p7), 16  }
  0x14   : > { %s1379_s19 = scalar_lea.vmem %s1657_s10, %s1101_s30  ;;  %s1276_s27 = smov (!%p1102_p7), 48  }
  0x15   : > { %s1278_s29 = smov (!%p1102_p7), 72  }
  0x17   : > { %v411_v0 = vld [vmem:[%s391_s28 + $0x18] sm:$0xff]  ;;  %vm417_vm0 = vcmask 31744   ;;  %v410_v1 = vld [vmem:[%s391_s28 + $0x10] sm:$0xff]  ;;  %v409_v2 = vld [vmem:[%s391_s28 + $0x8] sm:$0xff]  ;;  %vm512_vm1 = vcmask 261120   ;;  %vm430_vm2 = vcmask 1043456  }
  0x18   : > { %1108 = vmatpush.xpose.msk.msra.mxu1 %vm417_vm0, %v411_v0  ;;  %v408_v3 = vld [vmem:[%s391_s28] sm:$0xff]  ;;  %v405_v12 = vld [vmem:[%s1371_s25 + $0x8] sm:$0xff]  ;;  %v406_v14 = vld [vmem:[%s1371_s25 + $0x10] sm:$0xff]  ;;  %s1277_s28 = smov 24  }
  0x19   : > { %v412_v7 = vld [vmem:[%s1651_s4] sm:$0xf]  ;;  %v407_v20 = vld [vmem:[%s1371_s25 + $0x18] sm:$0xff] }
  0x1a   : > { %v404_v8 = vld [vmem:[%s1371_s25] sm:$0xff]  ;;  %1103 = vmatpush.msk.msra.mxu0 %vm430_vm2, %v412_v7 }
  0x1b   : > { %1104 = vmatmul.msk.f32.vlgmr.msra.gmra.mxu0 %vm417_vm0, %v404_v8  ;;  %v1210_v44 = vld [vmem:[%s1652_s5] ss:$0 sm:$0xff] }
  0x1c   : > { %1109 = vmatpush.xpose.msk.msra.mxu1 %vm417_vm0, %v410_v1 }
  0x20   : > { %1110 = vmatpush.xpose.msk.msra.mxu1 %vm417_vm0, %v409_v2 }
  0x23   : > { %1105 = vmatmul.msk.f32.gmra.mxu0 %vm417_vm0, %v405_v12 }
  0x24   : > { %1111 = vmatpush.xpose.msk.msra.mxu1 %vm417_vm0, %v408_v3 }
  0x27   : > { %1112 = vmatmul.msk.f32.vlgmr.msra.gmra.mxu1 %vm417_vm0, %v408_v3 }
  0x2b   : > { %1106 = vmatmul.msk.f32.gmra.mxu0 %vm417_vm0, %v406_v14 }
  0x2f   : > { %1113 = vmatmul.msk.f32.gmra.mxu1 %vm417_vm0, %v409_v2 }
  0x33   : > { %1107 = vmatmul.msk.f32.gmra.mxu0 %vm417_vm0, %v407_v20  ;;  %v1271_v20 = vmov 3  }
  0x34   : > { %1201 = vset.pattern.permute.xlu0 %v1271_v20 }
  0x37   : > { %1114 = vmatmul.msk.f32.gmra.mxu1 %vm417_vm0, %v410_v1  ;;  %v613_v1 = vld [vmem:[%s1649_s2] sm:$0xff] }
  0x38   : > { %v617_v7 = vmul.f32 0.5, %v613_v1 }
  0x3f   : > { %1115 = vmatmul.msk.f32.gmra.mxu1 %vm417_vm0, %v411_v0 }
  0x98   : > { %v451_v41 = vpop.f32.mrf.mxu0 }
  0x99   : > { %v452_v49 = vadd.f32 %v1210_v44, %v451_v41 }
  0x9b   : > { %v1432_v53 = vmax.f32 %v452_v49, 0.0 }
  0xa0   : > { %v454_v42 = vpop.f32.mrf.mxu0 }
  0xa1   : > { %v455_v47 = vadd.f32 %v1210_v44, %v454_v42 }
  0xa3   : > { %v1428_v52 = vmax.f32 %v455_v47, 0.0 }
  0xa4   : > { %v496_v4 = vpop.f32.mrf.mxu1 }
  0xa5   : > { %v508_v5 = vmax.f32 %v496_v4, 0.0 }
  0xa7   : > { %v513_v6 = vsel %vm512_vm1, %v508_v5, -inf }
  0xa8   : > { %514 = vmax.xlane.f32.xlu0 %v513_v6  ;;  %v457_v43 = vpop.f32.mrf.mxu0 }
  0xa9   : > { %v458_v45 = vadd.f32 %v1210_v44, %v457_v43 }
  0xab   : > { %v1424_v50 = vmax.f32 %v458_v45, 0.0 }
  0xac   : > { %v499_v9 = vpop.f32.mrf.mxu1 }
  0xad   : > { %v509_v10 = vmax.f32 %v499_v9, 0.0 }
  0xaf   : > { %v516_v11 = vsel %vm512_vm1, %v509_v10, -inf }
  0xb0   : > { %517 = vmax.xlane.f32.xlu0 %v516_v11  ;;  %v460_v46 = vpop.f32.mrf.mxu0 }
  0xb1   : > { %v461_v48 = vadd.f32 %v1210_v44, %v460_v46 }
  0xb3   : > { %v1426_v51 = vmax.f32 %v461_v48, 0.0 }
  0xb4   : > { %v502_v13 = vpop.f32.mrf.mxu1 }
  0xb5   : > { %v510_v18 = vmax.f32 %v502_v13, 0.0  ;;  %649 = vmatpush.msra.mxu2 %v1426_v51  ;;  %1134 = vmatpush.msra.mxu3 %v1426_v51 }
  0xb7   : > { %v519_v19 = vsel %vm512_vm1, %v510_v18, -inf  ;;  %650 = vmatpush.msra.mxu2 %v1424_v50  ;;  %1135 = vmatpush.msra.mxu3 %v1424_v50 }
  0xb9   : > { %651 = vmatpush.msra.mxu2 %v1428_v52  ;;  %1136 = vmatpush.msra.mxu3 %v1428_v52 }
  0xbb   : > { %652 = vmatpush.msra.mxu2 %v1432_v53  ;;  %1137 = vmatpush.msra.mxu3 %v1432_v53 }
  0xbc   : > { %v505_v15 = vpop.f32.mrf.mxu1 }
  0xbd   : > { %v511_v16 = vmax.f32 %v505_v15, 0.0 }
  0xbf   : > { %v522_v17 = vsel %vm512_vm1, %v511_v16, -inf }
  0xc0   : > { %523 = vmax.xlane.f32.xlu1 %v522_v17  ;;  %v614_v17 = vld [vmem:[%s1649_s2 + $0x8] sm:$0xff] }
  0xc8   : > { %520 = vmax.xlane.f32.xlu1 %v519_v19  ;;  %v1270_v19 = vmov 2  }
  0xc9   : > { %1200 = vset.pattern.permute.xlu2 %v1270_v19 }
 0x11b   : > { %v515_v21 = vpop.xlane.xlu0 %514 }
 0x11c   : > { %v525_v22 = vsub.f32 %v508_v5, %v515_v21 }
 0x11e   : > { %v529_v23 = vmul.f32 1.442695, %v525_v22 }
 0x120   : > { %1211 = vpow2.f32 %v529_v23  ;;  %v618_v23 = vmul.f32 0.5, %v614_v17 }
 0x123   : > { %v518_v24 = vpop.xlane.xlu0 %517 }
 0x124   : > { %v526_v25 = vsub.f32 %v509_v10, %v518_v24 }
 0x126   : > { %v1405_v26 = vpop.eup %1211  ;;  %v531_v27 = vmul.f32 1.442695, %v526_v25 }
 0x127   : > { %v537_v28 = vsel %vm512_vm1, %v1405_v26, 0.0 }
 0x128   : > { %1213 = vpow2.f32 %v531_v27  ;;  %538 = vadd.xlane.f32.xlu2 %v537_v28  ;;  %v1465_v27 = vld [vmem:[%s1650_s3] sm:$0xff] }
 0x12e   : > { %v1409_v29 = vpop.eup %1213 }
 0x12f   : > { %v540_v30 = vsel %vm512_vm1, %v1409_v29, 0.0 }
 0x130   : > { %541 = vadd.xlane.f32.xlu2 %v540_v30 }
 0x133   : > { %v524_v31 = vpop.xlane.xlu1 %523 }
 0x134   : > { %v528_v32 = vsub.f32 %v511_v16, %v524_v31 }
 0x136   : > { %v535_v33 = vmul.f32 1.442695, %v528_v32 }
 0x138   : > { %1215 = vpow2.f32 %v535_v33 }
 0x13b   : > { %v521_v34 = vpop.xlane.xlu1 %520 }
 0x13c   : > { %v527_v35 = vsub.f32 %v510_v18, %v521_v34  ;;  %v1454_v18 = vld [vmem:[%s1650_s3 + $0x10] sm:$0xff] }
 0x13e   : > { %v1413_v36 = vpop.eup %1215  ;;  %v533_v37 = vmul.f32 1.442695, %v527_v35 }
 0x13f   : > { %v546_v38 = vsel %vm512_vm1, %v1413_v36, 0.0 }
 0x140   : > { %1217 = vpow2.f32 %v533_v37  ;;  %547 = vadd.xlane.f32.xlu0 %v546_v38  ;;  %v616_v38 = vld [vmem:[%s1649_s2 + $0x18] sm:$0xff] }
 0x141   : > { %v620_v46 = vmul.f32 0.5, %v616_v38 }
 0x146   : > { %v1417_v39 = vpop.eup %1217 }
 0x147   : > { %v543_v40 = vsel %vm512_vm1, %v1417_v39, 0.0 }
 0x148   : > { %544 = vadd.xlane.f32.xlu1 %v543_v40  ;;  %802 = vperm.xlu2 %1200, %v1454_v18   ;;  %v1477_v40 = vld [vmem:[%s1650_s3 + $0x18] sm:$0xff] }
 0x150   : > { %794 = vperm.xlu2 %1200, %v1465_v27  }
 0x154   : > { %822 = vperm.xlu0 %1201, %v1454_v18  }
 0x158   : > { %806 = vperm.xlu2 %1200, %v1477_v40  }
 0x15c   : > { %814 = vperm.xlu0 %1201, %v1465_v27  }
 0x160   : > { %1205 = vset.pattern.permute.xlu2 %v1271_v20 }
 0x164   : > { %1204 = vset.pattern.permute.xlu0 %v1270_v19 }
 0x19b   : > { %v539_v54 = vpop.xlane.xlu2 %538 }
 0x19c   : > { %1219 = vrcp.f32 %v539_v54  ;;  %v560_v59 = vand.u32 2147483648, %v539_v54  ;;  %v558_v61 = vand.u32 2147483647, %v539_v54  ;;  %vm554_vm4 = vweird.f32 %v539_v54 }
 0x19e   : > { %v561_v0 = vor.u32 1.1754944e-38, %v560_v59  ;;  %vm559_vm6 = vcmp.eq.f32.partialorder %v558_v61, 8.507059e+37 }
 0x1a2   : > { %v1220_v55 = vpop.eup %1219 }
 0x1a3   : > { %v550_v56 = vmul.f32 %v1220_v55, %v539_v54  ;;  %v542_v57 = vpop.xlane.xlu2 %541  ;;  %vm555_vm3 = vweird.f32 %v1220_v55 }
 0x1a4   : > { %1221 = vrcp.f32 %v542_v57  ;;  %vm556_vm5 = vmor %vm554_vm4, %vm555_vm3  ;;  %v575_v9 = vand.u32 2147483648, %v542_v57  ;;  %v573_v11 = vand.u32 2147483647, %v542_v57  ;;  %vm569_vm8 = vweird.f32 %v542_v57 }
 0x1a5   : > { %v551_v58 = vsub.f32 1.0, %v550_v56  ;;  %vm740_vm4 = vcmask 130048  }
 0x1a6   : > { %v576_v14 = vor.u32 1.1754944e-38, %v575_v9  ;;  %vm574_vm10 = vcmp.eq.f32.partialorder %v573_v11, 8.507059e+37  ;;  %v1503_v9 = vld [vmem:[%s1650_s3 + $0x8] sm:$0xff] }
 0x1a7   : > { %v552_v60 = vmul.f32 %v1220_v55, %v551_v58  ;;  %v615_v58 = vld [vmem:[%s1649_s2 + $0x10] sm:$0xff] }
 0x1a8   : > { %v619_v61 = vmul.f32 0.5, %v615_v58 }
 0x1a9   : > { %v553_v62 = vadd.f32 %v1220_v55, %v552_v60 }
 0x1aa   : > { %v1222_v63 = vpop.eup %1221 }
 0x1ab   : > { %v565_v2 = vmul.f32 %v1222_v63, %v542_v57  ;;  %v557_v3 = vsel %vm556_vm5, %v1220_v55, %v553_v62  ;;  %vm570_vm7 = vweird.f32 %v1222_v63  ;;  %vm881_vm5 = vcmask 195584  }
 0x1ac   : > { %v562_v4 = vsel %vm559_vm6, %v561_v0, %v557_v3  ;;  %vm571_vm9 = vmor %vm569_vm8, %vm570_vm7  ;;  %vm891_vm6 = vcmask 588800   ;;  %vm886_vm7 = vcmask 392192   ;;  %vm912_vm8 = vcmask 785408  }
 0x1ad   : > { %v566_v5 = vsub.f32 1.0, %v565_v2  ;;  %v563_v6 = vmul.f32 %v1405_v26, %v562_v4 }
 0x1af   : > { %v567_v8 = vmul.f32 %v1222_v63, %v566_v5  ;;  %v609_v10 = vmul.f32 0.5, %v563_v6 }
 0x1b1   : > { %v568_v12 = vadd.f32 %v1222_v63, %v567_v8  ;;  %v1444_v13 = vadd.f32 %v617_v7, %v609_v10 }
 0x1b3   : > { %v548_v15 = vpop.xlane.xlu0 %547  ;;  %1116 = vmatmul.msk.f32.vlgmr.msra.gmra.mxu2 %vm512_vm1, %v1444_v13  ;;  %v572_v16 = vsel %vm571_vm9, %v1222_v63, %v568_v12 }
 0x1b4   : > { %1223 = vrcp.f32 %v548_v15  ;;  %v577_v21 = vsel %vm574_vm10, %v576_v14, %v572_v16  ;;  %v603_v33 = vand.u32 2147483647, %v548_v15  ;;  %vm599_vm12 = vweird.f32 %v548_v15 }
 0x1b5   : > { %v578_v22 = vmul.f32 %v1409_v29, %v577_v21  ;;  %v605_v29 = vand.u32 2147483648, %v548_v15  ;;  %v1275_v14 = vmov 0   ;;  %v803_v21 = vpop.permute.xlu2 %802 }
 0x1b6   : > { %vm604_vm14 = vcmp.eq.f32.partialorder %v603_v33, 8.507059e+37 }
 0x1b7   : > { %v610_v24 = vmul.f32 0.5, %v578_v22  ;;  %v606_v37 = vor.u32 1.1754944e-38, %v605_v29 }
 0x1b9   : > { %v1460_v26 = vadd.f32 %v618_v23, %v610_v24 }
 0x1ba   : > { %v1224_v25 = vpop.eup %1223 }
 0x1bb   : > { %v595_v28 = vmul.f32 %v1224_v25, %v548_v15  ;;  %v545_v30 = vpop.xlane.xlu1 %544  ;;  %1117 = vmatmul.msk.f32.gmra.mxu2 %vm512_vm1, %v1460_v26  ;;  %vm600_vm11 = vweird.f32 %v1224_v25 }
 0x1bc   : > { %1225 = vrcp.f32 %v545_v30  ;;  %vm601_vm13 = vmor %vm599_vm12, %vm600_vm11  ;;  %v590_v47 = vand.u32 2147483648, %v545_v30  ;;  %v588_v49 = vand.u32 2147483647, %v545_v30  ;;  %vm584_vm0 = vweird.f32 %v545_v30 }
 0x1bd   : > { %v596_v31 = vsub.f32 1.0, %v595_v28  ;;  %v795_v23 = vpop.permute.xlu2 %794 }
 0x1be   : > { %v591_v57 = vor.u32 1.1754944e-38, %v590_v47  ;;  %vm589_vm3 = vcmp.eq.f32.partialorder %v588_v49, 8.507059e+37 }
 0x1bf   : > { %v597_v32 = vmul.f32 %v1224_v25, %v596_v31 }
 0x1c1   : > { %v598_v34 = vadd.f32 %v1224_v25, %v597_v32 }
 0x1c2   : > { %v1226_v35 = vpop.eup %1225 }
 0x1c3   : > { %v580_v41 = vmul.f32 %v1226_v35, %v545_v30  ;;  %v602_v42 = vsel %vm601_vm13, %v1224_v25, %v598_v34  ;;  %vm585_vm15 = vweird.f32 %v1226_v35 }
 0x1c4   : > { %v607_v43 = vsel %vm604_vm14, %v606_v37, %v602_v42  ;;  %vm586_vm2 = vmor %vm584_vm0, %vm585_vm15 }
 0x1c5   : > { %v581_v44 = vsub.f32 1.0, %v580_v41  ;;  %v608_v45 = vmul.f32 %v1413_v36, %v607_v43  ;;  %v807_v25 = vpop.permute.xlu2 %806 }
 0x1c7   : > { %v582_v48 = vmul.f32 %v1226_v35, %v581_v44  ;;  %v612_v54 = vmul.f32 0.5, %v608_v45 }
 0x1c9   : > { %v583_v55 = vadd.f32 %v1226_v35, %v582_v48  ;;  %v624_v56 = vadd.f32 %v620_v46, %v612_v54 }
 0x1cb   : > { %1119 = vmatmul.msk.f32.vlgmr.msra.gmra.mxu3 %vm512_vm1, %v624_v56  ;;  %v587_v36 = vsel %vm586_vm2, %v1226_v35, %v583_v55 }
 0x1cc   : > { %v592_v59 = vsel %vm589_vm3, %v591_v57, %v587_v36 }
 0x1cd   : > { %v593_v60 = vmul.f32 %v1417_v39, %v592_v59  ;;  %v1273_v39 = vmov 1  }
 0x1ce   : > { %1199 = vset.pattern.permute.xlu1 %v1273_v39 }
 0x1cf   : > { %v611_v62 = vmul.f32 0.5, %v593_v60  ;;  %782 = vperm.xlu1 %1199, %v1454_v18   ;;  %v911_v60 = vld [vmem:[%s1653_s6 + $0x58] sm:$0xff] }
 0x1d0   : > { %1138 = vmatpush.msrb.mxu2 %v911_v60  ;;  %929 = vmatpush.msrb.mxu0 %v911_v60 }
 0x1d1   : > { %v623_v63 = vadd.f32 %v619_v61, %v611_v62  ;;  %v910_v61 = vld [vmem:[%s1653_s6 + $0x50] sm:$0xff]  ;;  %v909_v62 = vld [vmem:[%s1653_s6 + $0x48] sm:$0xff] }
 0x1d2   : > { %1139 = vmatpush.msrb.mxu2 %v910_v61  ;;  %930 = vmatpush.msrb.mxu0 %v910_v61 }
 0x1d3   : > { %1118 = vmatmul.msk.f32.gmra.mxu2 %vm512_vm1, %v623_v63 }
 0x1d4   : > { %1140 = vmatpush.msrb.mxu2 %v909_v62  ;;  %931 = vmatpush.msrb.mxu0 %v909_v62 }
 0x1d7   : > { %774 = vperm.xlu1 %1199, %v1465_v27  }
 0x1df   : > { %786 = vperm.xlu1 %1199, %v1477_v40  }
 0x1e7   : > { %1202 = vset.pattern.permute.xlu1 %v1271_v20 }
 0x1e8   : > { %826 = vperm.xlu1 %1202, %v1477_v40  }
 0x1f0   : > { %1203 = vset.pattern.permute.xlu1 %v1273_v39  ;;  %v902_v39 = vld [vmem:[%s1653_s6 + $0x10] sm:$0xff] }
 0x236   : > { %v654_v0 = vpop.f32.mrf.mxu2 }
 0x237   : > { %707 = vrot.lane.b32.xlu2 %v654_v0, %s1272_s23 }
 0x23e   : > { %v657_v1 = vpop.f32.mrf.mxu2 }
 0x23f   : > { %709 = vrot.lane.b32.xlu0 %v657_v1, %s1272_s23 }
 0x241   : > { %v783_v19 = vpop.permute.xlu1 %782 }
 0x249   : > { %v775_v22 = vpop.permute.xlu1 %774 }
 0x24e   : > { %v663_v2 = vpop.f32.mrf.mxu3 }
 0x24f   : > { %678 = vmatpush.msrb.mxu3 %v663_v2 }
 0x251   : > { %v787_v24 = vpop.permute.xlu1 %786 }
 0x256   : > { %v660_v3 = vpop.f32.mrf.mxu2 }
 0x257   : > { %711 = vrot.lane.b32.xlu2 %v660_v3, %s1272_s23  ;;  %679 = vmatpush.msrb.mxu3 %v660_v3  ;;  %v903_v3 = vld [vmem:[%s1653_s6 + $0x18] sm:$0xff] }
 0x259   : > { %680 = vmatpush.msrb.mxu3 %v657_v1  ;;  %v905_v1 = vld [vmem:[%s1653_s6 + $0x28] sm:$0xff] }
 0x25b   : > { %681 = vmatpush.msrb.mxu3 %v654_v0  ;;  %v906_v0 = vld [vmem:[%s1653_s6 + $0x30] sm:$0xff] }
 0x25c   : > { %1120 = vmatmul.msk.f32.vlgmr.msrb.gmra.mxu3 %vm512_vm1, %v1444_v13 }
 0x25f   : > { %713 = vrot.lane.b32.xlu2 %v663_v2, %s1272_s23  ;;  %v904_v2 = vld [vmem:[%s1653_s6 + $0x20] sm:$0xff] }
 0x264   : > { %1121 = vmatmul.msk.f32.gmra.mxu3 %vm512_vm1, %v1460_v26  ;;  %v827_v26 = vpop.permute.xlu1 %826 }
 0x26c   : > { %1122 = vmatmul.msk.f32.gmra.mxu3 %vm512_vm1, %v623_v63  ;;  %v907_v63 = vld [vmem:[%s1653_s6 + $0x38] sm:$0xff] }
 0x274   : > { %1123 = vmatmul.msk.f32.gmra.mxu3 %vm512_vm1, %v624_v56  ;;  %vm735_vm1 = vcmask 64512  }
 0x291   : > { %v708_v28 = vpop.permute.xlu2 %707 }
 0x292   : > { %v736_v31 = vsel %vm735_vm1, %v1432_v53, %v708_v28 }
 0x2b1   : > { %v712_v34 = vpop.permute.xlu2 %711 }
 0x2b9   : > { %v714_v37 = vpop.permute.xlu2 %713 }
 0x2ba   : > { %v739_v46 = vsel %vm735_vm1, %v1426_v51, %v714_v37 }
 0x2df   : > { %v683_v4 = vpop.f32.mrf.mxu3 }
 0x2e0   : > { %v695_v5 = vmul.f32 2.0, %v683_v4  ;;  %v901_v4 = vld [vmem:[%s1653_s6 + $0x8] sm:$0xff] }
 0x2e2   : > { %v699_v6 = vsub.f32 %v695_v5, %v1432_v53  ;;  %v738_v53 = vsel %vm735_vm1, %v1424_v50, %v712_v34  ;;  %v900_v5 = vld [vmem:[%s1653_s6] sm:$0xff] }
 0x2e4   : > { %723 = vrot.lane.b32.xlu1 %v699_v6, %s1274_s24 }
 0x2e7   : > { %v686_v7 = vpop.f32.mrf.mxu3 }
 0x2e8   : > { %v696_v8 = vmul.f32 2.0, %v686_v7 }
 0x2ea   : > { %v700_v10 = vsub.f32 %v696_v8, %v1428_v52 }
 0x2ec   : > { %778 = vperm.xlu1 %1203, %v1503_v9   ;;  %725 = vrot.lane.b32.xlu2 %v700_v10, %s1274_s24 }
 0x2ef   : > { %v689_v11 = vpop.f32.mrf.mxu3 }
 0x2f0   : > { %v697_v12 = vmul.f32 2.0, %v689_v11 }
 0x2f2   : > { %v701_v13 = vsub.f32 %v697_v12, %v1424_v50 }
 0x2f4   : > { %1206 = vset.pattern.permute.xlu1 %v1275_v14  ;;  %818 = vperm.xlu2 %1205, %v1503_v9  }
 0x2f5   : > { %727 = vrot.lane.b32.xlu0 %v701_v13, %s1274_s24  ;;  %761 = vperm.xlu1 %1206, %v1454_v18   ;;  %v823_v18 = vpop.permute.xlu0 %822 }
 0x2f7   : > { %v692_v15 = vpop.f32.mrf.mxu3 }
 0x2f8   : > { %v698_v16 = vmul.f32 2.0, %v692_v15 }
 0x2fa   : > { %v702_v17 = vsub.f32 %v698_v16, %v1426_v51 }
 0x2fc   : > { %1207 = vset.pattern.permute.xlu2 %v1275_v14 }
 0x2fd   : > { %729 = vrot.lane.b32.xlu0 %v702_v17, %s1274_s24  ;;  %766 = vperm.xlu1 %1206, %v1477_v40   ;;  %v815_v30 = vpop.permute.xlu0 %814 }
 0x2fe   : > { %751 = vperm.xlu2 %1207, %v1465_v27  }
 0x305   : > { %798 = vperm.xlu0 %1204, %v1503_v9   ;;  %v710_v35 = vpop.permute.xlu0 %709 }
 0x306   : > { %v737_v50 = vsel %vm735_vm1, %v1428_v52, %v710_v35 }
 0x30d   : > { %1208 = vset.pattern.permute.xlu0 %v1275_v14 }
 0x346   : > { %v726_v44 = vpop.permute.xlu2 %725 }
 0x347   : > { %v1536_v48 = vsel %vm740_vm4, %v737_v50, %v726_v44  ;;  %v899_v50 = vld [vmem:[%s1654_s7 + $0x18] sm:$0xff] }
 0x34e   : > { %v819_v57 = vpop.permute.xlu2 %818 }
 0x34f   : > { %v830_v36 = vmul.f32 %v819_v57, %v1536_v48 }
 0x356   : > { %v724_v29 = vpop.permute.xlu1 %723 }
 0x357   : > { %v1517_v27 = vsel %vm740_vm4, %v736_v31, %v724_v29 }
 0x358   : > { %v809_v32 = vmul.f32 %v795_v23, %v1517_v27  ;;  %v789_v33 = vmul.f32 %v775_v22, %v1517_v27  ;;  %v829_v56 = vmul.f32 %v815_v30, %v1517_v27  ;;  %v752_v6 = vpop.permute.xlu2 %751 }
 0x35a   : > { %853 = vrot.lane.b32.xlu2 %v809_v32, %s1276_s27  ;;  %837 = vrot.lane.b32.xlu0 %v789_v33, %s1277_s28 }
 0x35e   : > { %v779_v45 = vpop.permute.xlu1 %778 }
 0x35f   : > { %v790_v54 = vmul.f32 %v779_v45, %v1536_v48 }
 0x367   : > { %v728_v38 = vpop.permute.xlu0 %727  ;;  %v762_v7 = vpop.permute.xlu1 %761 }
 0x368   : > { %v1525_v40 = vsel %vm740_vm4, %v738_v53, %v728_v38 }
 0x369   : > { %v811_v41 = vmul.f32 %v803_v21, %v1525_v40  ;;  %v791_v42 = vmul.f32 %v783_v19, %v1525_v40  ;;  %v831_v43 = vmul.f32 %v823_v18, %v1525_v40  ;;  %v771_v12 = vmul.f32 %v762_v7, %v1525_v40  ;;  %v898_v40 = vld [vmem:[%s1654_s7 + $0x10] sm:$0xff] }
 0x36a   : > { %v769_v19 = vmul.f32 %v752_v6, %v1517_v27 }
 0x36b   : > { %857 = vrot.lane.b32.xlu1 %v811_v41, %s1276_s27  ;;  %841 = vrot.lane.b32.xlu2 %v791_v42, %s1277_s28  ;;  %v896_v42 = vld [vmem:[%s1654_s7] sm:$0xff] }
 0x36c   : > { %873 = vrot.lane.b32.xlu0 %v831_v43, %s1278_s29 }
 0x36f   : > { %v730_v47 = vpop.permute.xlu0 %729 }
 0x370   : > { %v1539_v49 = vsel %vm740_vm4, %v739_v46, %v730_v47 }
 0x371   : > { %v792_v55 = vmul.f32 %v787_v24, %v1539_v49  ;;  %v812_v52 = vmul.f32 %v807_v25, %v1539_v49  ;;  %v832_v51 = vmul.f32 %v827_v26, %v1539_v49 }
 0x373   : > { %839 = vrot.lane.b32.xlu2 %v790_v54, %s1277_s28  ;;  %843 = vrot.lane.b32.xlu1 %v792_v55, %s1277_s28 }
 0x374   : > { %869 = vrot.lane.b32.xlu0 %v829_v56, %s1278_s29 }
 0x377   : > { %v799_v58 = vpop.permute.xlu0 %798 }
 0x378   : > { %v810_v59 = vmul.f32 %v799_v58, %v1536_v48 }
 0x37b   : > { %859 = vrot.lane.b32.xlu2 %v812_v52, %s1276_s27  ;;  %875 = vrot.lane.b32.xlu1 %v832_v51, %s1278_s29 }
 0x37c   : > { %756 = vperm.xlu0 %1208, %v1503_v9   ;;  %v767_v9 = vpop.permute.xlu1 %766 }
 0x37d   : > { %v772_v26 = vmul.f32 %v767_v9, %v1539_v49 }
 0x383   : > { %871 = vrot.lane.b32.xlu2 %v830_v36, %s1278_s29  ;;  %855 = vrot.lane.b32.xlu1 %v810_v59, %s1276_s27 }
 0x384   : > { %1209 = vset.pattern.permute.xlu0 %v1271_v20  ;;  %v908_v20 = vld [vmem:[%s1653_s6 + $0x40] sm:$0xff] }
 0x385   : > { %1141 = vmatpush.msrb.mxu2 %v908_v20  ;;  %932 = vmatpush.msrb.mxu0 %v908_v20 }
 0x387   : > { %1142 = vmatpush.msrb.mxu2 %v907_v63  ;;  %933 = vmatpush.msrb.mxu0 %v907_v63 }
 0x389   : > { %1143 = vmatpush.msrb.mxu2 %v906_v0  ;;  %934 = vmatpush.msrb.mxu0 %v906_v0 }
 0x38b   : > { %1144 = vmatpush.msrb.mxu2 %v905_v1  ;;  %935 = vmatpush.msrb.mxu0 %v905_v1 }
 0x38d   : > { %1145 = vmatpush.msrb.mxu2 %v904_v2  ;;  %936 = vmatpush.msrb.mxu0 %v904_v2 }
 0x38f   : > { %1146 = vmatpush.msrb.mxu2 %v903_v3  ;;  %937 = vmatpush.msrb.mxu0 %v903_v3 }
 0x391   : > { %1147 = vmatpush.msrb.mxu2 %v902_v39  ;;  %938 = vmatpush.msrb.mxu0 %v902_v39 }
 0x393   : > { %1148 = vmatpush.msrb.mxu2 %v901_v4  ;;  %939 = vmatpush.msrb.mxu0 %v901_v4 }
 0x395   : > { %1149 = vmatpush.msrb.mxu2 %v900_v5  ;;  %940 = vmatpush.msrb.mxu0 %v900_v5 }
 0x3b4   : > { %v854_v8 = vpop.permute.xlu2 %853 }
 0x3c5   : > { %v842_v11 = vpop.permute.xlu2 %841 }
 0x3c6   : > { %v884_v13 = vsel %vm881_vm5, %v771_v12, %v842_v11 }
 0x3cc   : > { %v838_v10 = vpop.permute.xlu0 %837 }
 0x3cd   : > { %v840_v21 = vpop.permute.xlu2 %839  ;;  %v882_v22 = vsel %vm881_vm5, %v769_v19, %v838_v10 }
 0x3ce   : > { %v887_v24 = vsel %vm886_vm7, %v882_v22, %v854_v8 }
 0x3d5   : > { %v860_v30 = vpop.permute.xlu2 %859 }
 0x3dd   : > { %v858_v14 = vpop.permute.xlu1 %857  ;;  %v872_v37 = vpop.permute.xlu2 %871 }
 0x3de   : > { %v889_v15 = vsel %vm886_vm7, %v884_v13, %v858_v14  ;;  %v874_v16 = vpop.permute.xlu0 %873 }
 0x3df   : > { %v894_v17 = vsel %vm891_vm6, %v889_v15, %v874_v16 }
 0x3e0   : > { %1126 = vmatmul.msk.f32.vlgmr.msrb.gmra.mxu2 %vm912_vm8, %v894_v17 }
 0x3e5   : > { %v844_v23 = vpop.permute.xlu1 %843 }
 0x3e6   : > { %v870_v25 = vpop.permute.xlu0 %869  ;;  %v885_v28 = vsel %vm881_vm5, %v772_v26, %v844_v23 }
 0x3e7   : > { %v892_v18 = vsel %vm891_vm6, %v887_v24, %v870_v25  ;;  %v890_v29 = vsel %vm886_vm7, %v885_v28, %v860_v30 }
 0x3e8   : > { %1124 = vmatmul.msk.f32.vlgmr.msrb.gmra.mxu0 %vm912_vm8, %v892_v18 }
 0x3ed   : > { %v876_v31 = vpop.permute.xlu1 %875 }
 0x3ee   : > { %v757_v27 = vpop.permute.xlu0 %756  ;;  %v895_v32 = vsel %vm891_vm6, %v890_v29, %v876_v31 }
 0x3ef   : > { %1127 = vmatmul.msk.f32.gmra.mxu2 %vm912_vm8, %v895_v32  ;;  %v770_v33 = vmul.f32 %v757_v27, %v1536_v48  ;;  %v897_v48 = vld [vmem:[%s1654_s7 + $0x8] sm:$0xff] }
 0x3f1   : > { %v883_v35 = vsel %vm881_vm5, %v770_v33, %v840_v21 }
 0x3f5   : > { %v856_v34 = vpop.permute.xlu1 %855 }
 0x3f6   : > { %v888_v53 = vsel %vm886_vm7, %v883_v35, %v856_v34 }
 0x3f7   : > { %v893_v38 = vsel %vm891_vm6, %v888_v53, %v872_v37 }
 0x3f8   : > { %1125 = vmatmul.msk.f32.gmra.mxu0 %vm912_vm8, %v893_v38 }
 0x463   : > { %v948_v41 = vpop.f32.mrf.mxu2 }
 0x464   : > { %v956_v43 = vadd.f32 %v948_v41, %v898_v40 }
 0x465   : > { %v942_v44 = vpop.f32.mrf.mxu0 }
 0x466   : > { %960 = vst.msk [vmem:[#allocation2 + $0x10] sm:$0xff] %vm735_vm1, %v956_v43  ;;  %v954_v45 = vadd.f32 %v942_v44, %v896_v42 }
 0x468   : > { %958 = vst.msk [vmem:[#allocation2] sm:$0xff] %vm735_vm1, %v954_v45 }
 0x472   : > { %v951_v46 = vpop.f32.mrf.mxu2 }
 0x473   : > { %v957_v47 = vadd.f32 %v951_v46, %v899_v50 }
 0x475   : > { %961 = vst.msk [vmem:[#allocation2 + $0x18] sm:$0xff] %vm735_vm1, %v957_v47  ;;  %v945_v49 = vpop.f32.mrf.mxu0 }
 0x476   : > { %v955_v54 = vadd.f32 %v945_v49, %v897_v48 }
 0x478   : > { %959 = vst.msk [vmem:[#allocation2 + $0x8] sm:$0xff] %vm735_vm1, %v955_v54 }
 0x479 PF: > { %v965_v55 = vld [vmem:[%s1655_s8] sm:$0xff]  ;;  %s1128_s22 = sshll.u32 %s1252_s13, 3  ;;  %vm970_vm9 = vcmask 64512   ;;  %vm995_vm10 = vcmask 130048  }
 0x47a   : > { %989 = vmatpush.msra.mxu0 %v965_v55  ;;  %s963_s23 = scalar_lea.vmem [#allocation2], %s1128_s22  ;;  %v1227_v52 = vld [vmem:[%s1656_s9] ss:$0 sm:$0xff] }
 0x47f   : > { %v964_v56 = vld [vmem:[%s963_s23] sm:$0xff] }
 0x480   : > { %1129 = vmatmul.msk.f32.vlgmr.msra.gmra.mxu0 %vm970_vm9, %v964_v56 }
 0x4fd   : > { %v991_v51 = vpop.f32.mrf.mxu0 }
 0x4fe   : > { %v992_v57 = vadd.f32 %v1227_v52, %v991_v51 }
 0x500   : > { %1228 = vtanh.f32 %v992_v57 }
 0x506   : > { %v1229_v58 = vpop.eup %1228 }
 0x507   : > { %996 = vst.msk [vmem:[%s1379_s19] sm:$0xff] %vm995_vm10, %v1229_v58 }
 0x508 PF: > { %s20_s17 = sadd.s32 1, %s1268_s17   ;;  %s1659_s26 = sld [smem:[#allocation3_spill]] }
 0x509   : > { %p17_p8 = scmp.ge.s32.totalorder %s20_s17, 10   ;;  %s1660_s13 = smov %s1260_s15 }
 0x50a   : > { %s1661_s14 = smov %s1264_s16  ;;  %s1662_s15 = smov %s1665_s18 }
 0x50b   :  { %19 = sbr.rel (!%p17_p8) target bundleno = 3 (0x3), region = 98 }
 0x50e   : > { %s1663_s16 = smov %s1659_s26 }

// kernel: tpu_custom_call.1
= control target key start
LH: loop header
LB: loop body
LE: loop exit
PB: predicated region body
PF: predicated region fallthrough
CT: control target
= control target key end

     0   :  { %s1334_s13 = smov 0   ;;  %s1336_s14 = smov 0   ;;  %s1647_s0 = inlined_call_operand.vmem [shape: f32[2,32,4], index: 0, kind: input, shape index: {}]   ;;  %s1648_s1 = inlined_call_operand.vmem [shape: f32[2,32,4], index: 1, kind: input, shape index: {}]   ;;  %s1649_s2 = inlined_call_operand.vmem [shape: f32[32,32], index: 2, kind: input, shape index: {}]   ;;  %s1650_s3 = inlined_call_operand.vmem [shape: f32[32,4], index: 3, kind: input, shape index: {}]   ;;  %s1651_s4 = inlined_call_operand.vmem [shape: f32[4,8], index: 4, kind: input, shape index: {}]   ;;  %s1652_s5 = inlined_call_operand.vmem [shape: f32[1,8], index: 5, kind: input, shape index: {}]   ;;  %s1653_s6 = inlined_call_operand.vmem [shape: f32[96,8], index: 6, kind: input, shape index: {}]   ;;  %s1654_s7 = inlined_call_operand.vmem [shape: f32[32,8], index: 7, kind: input, shape index: {}]   ;;  %s1655_s8 = inlined_call_operand.vmem [shape: f32[8,16], index: 8, kind: input, shape index: {}]   ;;  %s1656_s9 = inlined_call_operand.vmem [shape: f32[1,16], index: 9, kind: input, shape index: {}]   ;;  %s1657_s10 = inlined_call_operand.vmem [shape: f32[2,32,16], index: 10, kind: output, shape index: {}]  }
   0x1   :  { %s1338_s15 = smov 0   ;;  %s1340_s16 = smov 0  }
   0x2   :  { %s1342_s17 = smov 0  }
   0x3 LB: > { %s29_s18 = sadd.s32 1, %s1260_s15  ;;  %s32_s19 = sadd.s32 1, %s1264_s16  ;;  %s1268_s17 = sphi %s1342_s17, %s20_s17   ;;  %s1264_s16 = sphi %s1340_s16, %s1663_s16   ;;  %s1260_s15 = sphi %s1338_s15, %s1662_s15   ;;  %s1256_s14 = sphi %s1336_s14, %s1661_s14   ;;  %s1252_s13 = sphi %s1334_s13, %s1660_s13  }
   0x4   : > { %p30_p0 = scmp.ge.s32.totalorder %s29_s18, 4  ;;  %p1095_p1 = scmp.ge.s32.totalorder %s1268_s17, 1 }
   0x5   : > { %p336_p2 = scmp.lt.s32.totalorder %s1268_s17, 9 }
   0x6   : > { %s1665_s18 = smov (%p30_p0, %s29_s18), 0  ;;  %s1667_s19 = smov (!%p30_p0, %s32_s19), %s1264_s16 }
   0x7   : > { %p337_p3 = pnand %p1095_p1, %p336_p2  ;;  %p34_p4 = scmp.ge.s32.totalorder %s1667_s19, 2 }
   0x8   : > { %p382_p5 = scmp.lt.s32.totalorder (!%p337_p3), %s1256_s14, 1  ;;  %p394_p6 = scmp.lt.s32.totalorder (!%p337_p3), %s1252_s13, 3 }
   0x9   : > { %s1669_s19 = smov (%p34_p4, %s1667_s19), 0  ;;  %340 = sbr.rel (%p337_p3) target bundleno = 1288 (0x508), region = 60 }
   0xa   : > { %1658 = sst [smem:[#allocation3_spill]] %s1669_s19  ;;  %p1102_p7 = scmp.ne.s32.totalorder (!%p337_p3), %s1252_s13, 0 }
   0xe   : > { %s1671_s14 = smov (!%p382_p5, %s1256_s14), 1  ;;  %s1272_s23 = smov (!%p1102_p7), 8  }
   0xf   : > { %s395_s20 = scalar_select %p394_p6, %s1252_s13, 3 }
  0x10   : > { %s1132_s21 = sshll.u32 %s1671_s14, 5  ;;  %s1100_s22 = sshll.u32 %s1671_s14, 2 }
  0x11   : > { %s1371_s25 = scalar_lea.vmem %s1647_s0, %s1132_s21  ;;  %s391_s28 = scalar_lea.vmem %s1648_s1, %s1132_s21 }
  0x12   : > { %s397_s29 = sadd.s32 %s1100_s22, %s395_s20  ;;  %403 = sbr.rel (%p1102_p7) target bundleno = 1145 (0x479), region = 64 }
  0x13   : > { %s1101_s30 = sshll.u32 %s397_s29, 3  ;;  %s1274_s24 = smov (!%p1102_p7), 16  }
  0x14   : > { %s1379_s19 = scalar_lea.vmem %s1657_s10, %s1101_s30  ;;  %s1276_s27 = smov (!%p1102_p7), 48  }
  0x15   : > { %s1278_s29 = smov (!%p1102_p7), 72  }
  0x17   : > { %v411_v0 = vld [vmem:[%s391_s28 + $0x18] sm:$0xff]  ;;  %vm417_vm0 = vcmask 31744   ;;  %v410_v1 = vld [vmem:[%s391_s28 + $0x10] sm:$0xff]  ;;  %v409_v2 = vld [vmem:[%s391_s28 + $0x8] sm:$0xff]  ;;  %vm512_vm1 = vcmask 261120   ;;  %vm430_vm2 = vcmask 1043456  }
  0x18   : > { %1108 = vmatpush.xpose.msk.msra.mxu1 %vm417_vm0, %v411_v0  ;;  %v408_v3 = vld [vmem:[%s391_s28] sm:$0xff]  ;;  %v405_v12 = vld [vmem:[%s1371_s25 + $0x8] sm:$0xff]  ;;  %v406_v14 = vld [vmem:[%s1371_s25 + $0x10] sm:$0xff]  ;;  %s1277_s28 = smov 24  }
  0x19   : > { %v412_v7 = vld [vmem:[%s1651_s4] sm:$0xf]  ;;  %v407_v20 = vld [vmem:[%s1371_s25 + $0x18] sm:$0xff] }
  0x1a   : > { %v404_v8 = vld [vmem:[%s1371_s25] sm:$0xff]  ;;  %1103 = vmatpush.msk.msra.mxu0 %vm430_vm2, %v412_v7 }
  0x1b   : > { %1104 = vmatmul.msk.f32.vlgmr.msra.gmra.mxu0 %vm417_vm0, %v404_v8  ;;  %v1210_v44 = vld [vmem:[%s1652_s5] ss:$0 sm:$0xff] }
  0x1c   : > { %1109 = vmatpush.xpose.msk.msra.mxu1 %vm417_vm0, %v410_v1 }
  0x20   : > { %1110 = vmatpush.xpose.msk.msra.mxu1 %vm417_vm0, %v409_v2 }
  0x23   : > { %1105 = vmatmul.msk.f32.gmra.mxu0 %vm417_vm0, %v405_v12 }
  0x24   : > { %1111 = vmatpush.xpose.msk.msra.mxu1 %vm417_vm0, %v408_v3 }
  0x27   : > { %1112 = vmatmul.msk.f32.vlgmr.msra.gmra.mxu1 %vm417_vm0, %v408_v3 }
  0x2b   : > { %1106 = vmatmul.msk.f32.gmra.mxu0 %vm417_vm0, %v406_v14 }
  0x2f   : > { %1113 = vmatmul.msk.f32.gmra.mxu1 %vm417_vm0, %v409_v2 }
  0x33   : > { %1107 = vmatmul.msk.f32.gmra.mxu0 %vm417_vm0, %v407_v20  ;;  %v1271_v20 = vmov 3  }
  0x34   : > { %1201 = vset.pattern.permute.xlu0 %v1271_v20 }
  0x37   : > { %1114 = vmatmul.msk.f32.gmra.mxu1 %vm417_vm0, %v410_v1  ;;  %v613_v1 = vld [vmem:[%s1649_s2] sm:$0xff] }
  0x38   : > { %v617_v7 = vmul.f32 0.5, %v613_v1 }
  0x3f   : > { %1115 = vmatmul.msk.f32.gmra.mxu1 %vm417_vm0, %v411_v0 }
  0x98   : > { %v451_v41 = vpop.f32.mrf.mxu0 }
  0x99   : > { %v452_v49 = vadd.f32 %v1210_v44, %v451_v41 }
  0x9b   : > { %v1432_v53 = vmax.f32 %v452_v49, 0.0 }
  0xa0   : > { %v454_v42 = vpop.f32.mrf.mxu0 }
  0xa1   : > { %v455_v47 = vadd.f32 %v1210_v44, %v454_v42 }
  0xa3   : > { %v1428_v52 = vmax.f32 %v455_v47, 0.0 }
  0xa4   : > { %v496_v4 = vpop.f32.mrf.mxu1 }
  0xa5   : > { %v508_v5 = vmax.f32 %v496_v4, 0.0 }
  0xa7   : > { %v513_v6 = vsel %vm512_vm1, %v508_v5, -inf }
  0xa8   : > { %514 = vmax.xlane.f32.xlu0 %v513_v6  ;;  %v457_v43 = vpop.f32.mrf.mxu0 }
  0xa9   : > { %v458_v45 = vadd.f32 %v1210_v44, %v457_v43 }
  0xab   : > { %v1424_v50 = vmax.f32 %v458_v45, 0.0 }
  0xac   : > { %v499_v9 = vpop.f32.mrf.mxu1 }
  0xad   : > { %v509_v10 = vmax.f32 %v499_v9, 0.0 }
  0xaf   : > { %v516_v11 = vsel %vm512_vm1, %v509_v10, -inf }
  0xb0   : > { %517 = vmax.xlane.f32.xlu0 %v516_v11  ;;  %v460_v46 = vpop.f32.mrf.mxu0 }
  0xb1   : > { %v461_v48 = vadd.f32 %v1210_v44, %v460_v46 }
  0xb3   : > { %v1426_v51 = vmax.f32 %v461_v48, 0.0 }
  0xb4   : > { %v502_v13 = vpop.f32.mrf.mxu1 }
  0xb5   : > { %v510_v18 = vmax.f32 %v502_v13, 0.0  ;;  %649 = vmatpush.msra.mxu2 %v1426_v51  ;;  %1134 = vmatpush.msra.mxu3 %v1426_v51 }
  0xb7   : > { %v519_v19 = vsel %vm512_vm1, %v510_v18, -inf  ;;  %650 = vmatpush.msra.mxu2 %v1424_v50  ;;  %1135 = vmatpush.msra.mxu3 %v1424_v50 }
  0xb9   : > { %651 = vmatpush.msra.mxu2 %v1428_v52  ;;  %1136 = vmatpush.msra.mxu3 %v1428_v52 }
  0xbb   : > { %652 = vmatpush.msra.mxu2 %v1432_v53  ;;  %1137 = vmatpush.msra.mxu3 %v1432_v53 }
  0xbc   : > { %v505_v15 = vpop.f32.mrf.mxu1 }
  0xbd   : > { %v511_v16 = vmax.f32 %v505_v15, 0.0 }
  0xbf   : > { %v522_v17 = vsel %vm512_vm1, %v511_v16, -inf }
  0xc0   : > { %523 = vmax.xlane.f32.xlu1 %v522_v17  ;;  %v614_v17 = vld [vmem:[%s1649_s2 + $0x8] sm:$0xff] }
  0xc8   : > { %520 = vmax.xlane.f32.xlu1 %v519_v19  ;;  %v1270_v19 = vmov 2  }
  0xc9   : > { %1200 = vset.pattern.permute.xlu2 %v1270_v19 }
 0x11b   : > { %v515_v21 = vpop.xlane.xlu0 %514 }
 0x11c   : > { %v525_v22 = vsub.f32 %v508_v5, %v515_v21 }
 0x11e   : > { %v529_v23 = vmul.f32 1.442695, %v525_v22 }
 0x120   : > { %1211 = vpow2.f32 %v529_v23  ;;  %v618_v23 = vmul.f32 0.5, %v614_v17 }
 0x123   : > { %v518_v24 = vpop.xlane.xlu0 %517 }
 0x124   : > { %v526_v25 = vsub.f32 %v509_v10, %v518_v24 }
 0x126   : > { %v1405_v26 = vpop.eup %1211  ;;  %v531_v27 = vmul.f32 1.442695, %v526_v25 }
 0x127   : > { %v537_v28 = vsel %vm512_vm1, %v1405_v26, 0.0 }
 0x128   : > { %1213 = vpow2.f32 %v531_v27  ;;  %538 = vadd.xlane.f32.xlu2 %v537_v28  ;;  %v1465_v27 = vld [vmem:[%s1650_s3] sm:$0xff] }
 0x12e   : > { %v1409_v29 = vpop.eup %1213 }
 0x12f   : > { %v540_v30 = vsel %vm512_vm1, %v1409_v29, 0.0 }
 0x130   : > { %541 = vadd.xlane.f32.xlu2 %v540_v30 }
 0x133   : > { %v524_v31 = vpop.xlane.xlu1 %523 }
 0x134   : > { %v528_v32 = vsub.f32 %v511_v16, %v524_v31 }
 0x136   : > { %v535_v33 = vmul.f32 1.442695, %v528_v32 }
 0x138   : > { %1215 = vpow2.f32 %v535_v33 }
 0x13b   : > { %v521_v34 = vpop.xlane.xlu1 %520 }
 0x13c   : > { %v527_v35 = vsub.f32 %v510_v18, %v521_v34  ;;  %v1454_v18 = vld [vmem:[%s1650_s3 + $0x10] sm:$0xff] }
 0x13e   : > { %v1413_v36 = vpop.eup %1215  ;;  %v533_v37 = vmul.f32 1.442695, %v527_v35 }
 0x13f   : > { %v546_v38 = vsel %vm512_vm1, %v1413_v36, 0.0 }
 0x140   : > { %1217 = vpow2.f32 %v533_v37  ;;  %547 = vadd.xlane.f32.xlu0 %v546_v38  ;;  %v616_v38 = vld [vmem:[%s1649_s2 + $0x18] sm:$0xff] }
 0x141   : > { %v620_v46 = vmul.f32 0.5, %v616_v38 }
 0x146   : > { %v1417_v39 = vpop.eup %1217 }
 0x147   : > { %v543_v40 = vsel %vm512_vm1, %v1417_v39, 0.0 }
 0x148   : > { %544 = vadd.xlane.f32.xlu1 %v543_v40  ;;  %802 = vperm.xlu2 %1200, %v1454_v18   ;;  %v1477_v40 = vld [vmem:[%s1650_s3 + $0x18] sm:$0xff] }
 0x150   : > { %794 = vperm.xlu2 %1200, %v1465_v27  }
 0x154   : > { %822 = vperm.xlu0 %1201, %v1454_v18  }
 0x158   : > { %806 = vperm.xlu2 %1200, %v1477_v40  }
 0x15c   : > { %814 = vperm.xlu0 %1201, %v1465_v27  }
 0x160   : > { %1205 = vset.pattern.permute.xlu2 %v1271_v20 }
 0x164   : > { %1204 = vset.pattern.permute.xlu0 %v1270_v19 }
 0x19b   : > { %v539_v54 = vpop.xlane.xlu2 %538 }
 0x19c   : > { %1219 = vrcp.f32 %v539_v54  ;;  %v560_v59 = vand.u32 2147483648, %v539_v54  ;;  %v558_v61 = vand.u32 2147483647, %v539_v54  ;;  %vm554_vm4 = vweird.f32 %v539_v54 }
 0x19e   : > { %v561_v0 = vor.u32 1.1754944e-38, %v560_v59  ;;  %vm559_vm6 = vcmp.eq.f32.partialorder %v558_v61, 8.507059e+37 }
 0x1a2   : > { %v1220_v55 = vpop.eup %1219 }
 0x1a3   : > { %v550_v56 = vmul.f32 %v1220_v55, %v539_v54  ;;  %v542_v57 = vpop.xlane.xlu2 %541  ;;  %vm555_vm3 = vweird.f32 %v1220_v55 }
 0x1a4   : > { %1221 = vrcp.f32 %v542_v57  ;;  %vm556_vm5 = vmor %vm554_vm4, %vm555_vm3  ;;  %v575_v9 = vand.u32 2147483648, %v542_v57  ;;  %v573_v11 = vand.u32 2147483647, %v542_v57  ;;  %vm569_vm8 = vweird.f32 %v542_v57 }
 0x1a5   : > { %v551_v58 = vsub.f32 1.0, %v550_v56  ;;  %vm740_vm4 = vcmask 130048  }
 0x1a6   : > { %v576_v14 = vor.u32 1.1754944e-38, %v575_v9  ;;  %vm574_vm10 = vcmp.eq.f32.partialorder %v573_v11, 8.507059e+37  ;;  %v1503_v9 = vld [vmem:[%s1650_s3 + $0x8] sm:$0xff] }
 0x1a7   : > { %v552_v60 = vmul.f32 %v1220_v55, %v551_v58  ;;  %v615_v58 = vld [vmem:[%s1649_s2 + $0x10] sm:$0xff] }
 0x1a8   : > { %v619_v61 = vmul.f32 0.5, %v615_v58 }
 0x1a9   : > { %v553_v62 = vadd.f32 %v1220_v55, %v552_v60 }
 0x1aa   : > { %v1222_v63 = vpop.eup %1221 }
 0x1ab   : > { %v565_v2 = vmul.f32 %v1222_v63, %v542_v57  ;;  %v557_v3 = vsel %vm556_vm5, %v1220_v55, %v553_v62  ;;  %vm570_vm7 = vweird.f32 %v1222_v63  ;;  %vm881_vm5 = vcmask 195584  }
 0x1ac   : > { %v562_v4 = vsel %vm559_vm6, %v561_v0, %v557_v3  ;;  %vm571_vm9 = vmor %vm569_vm8, %vm570_vm7  ;;  %vm891_vm6 = vcmask 588800   ;;  %vm886_vm7 = vcmask 392192   ;;  %vm912_vm8 = vcmask 785408  }
 0x1ad   : > { %v566_v5 = vsub.f32 1.0, %v565_v2  ;;  %v563_v6 = vmul.f32 %v1405_v26, %v562_v4 }
 0x1af   : > { %v567_v8 = vmul.f32 %v1222_v63, %v566_v5  ;;  %v609_v10 = vmul.f32 0.5, %v563_v6 }
 0x1b1   : > { %v568_v12 = vadd.f32 %v1222_v63, %v567_v8  ;;  %v1444_v13 = vadd.f32 %v617_v7, %v609_v10 }
 0x1b3   : > { %v548_v15 = vpop.xlane.xlu0 %547  ;;  %1116 = vmatmul.msk.f32.vlgmr.msra.gmra.mxu2 %vm512_vm1, %v1444_v13  ;;  %v572_v16 = vsel %vm571_vm9, %v1222_v63, %v568_v12 }
 0x1b4   : > { %1223 = vrcp.f32 %v548_v15  ;;  %v577_v21 = vsel %vm574_vm10, %v576_v14, %v572_v16  ;;  %v603_v33 = vand.u32 2147483647, %v548_v15  ;;  %vm599_vm12 = vweird.f32 %v548_v15 }
 0x1b5   : > { %v578_v22 = vmul.f32 %v1409_v29, %v577_v21  ;;  %v605_v29 = vand.u32 2147483648, %v548_v15  ;;  %v1275_v14 = vmov 0   ;;  %v803_v21 = vpop.permute.xlu2 %802 }
 0x1b6   : > { %vm604_vm14 = vcmp.eq.f32.partialorder %v603_v33, 8.507059e+37 }
 0x1b7   : > { %v610_v24 = vmul.f32 0.5, %v578_v22  ;;  %v606_v37 = vor.u32 1.1754944e-38, %v605_v29 }
 0x1b9   : > { %v1460_v26 = vadd.f32 %v618_v23, %v610_v24 }
 0x1ba   : > { %v1224_v25 = vpop.eup %1223 }
 0x1bb   : > { %v595_v28 = vmul.f32 %v1224_v25, %v548_v15  ;;  %v545_v30 = vpop.xlane.xlu1 %544  ;;  %1117 = vmatmul.msk.f32.gmra.mxu2 %vm512_vm1, %v1460_v26  ;;  %vm600_vm11 = vweird.f32 %v1224_v25 }
 0x1bc   : > { %1225 = vrcp.f32 %v545_v30  ;;  %vm601_vm13 = vmor %vm599_vm12, %vm600_vm11  ;;  %v590_v47 = vand.u32 2147483648, %v545_v30  ;;  %v588_v49 = vand.u32 2147483647, %v545_v30  ;;  %vm584_vm0 = vweird.f32 %v545_v30 }
 0x1bd   : > { %v596_v31 = vsub.f32 1.0, %v595_v28  ;;  %v795_v23 = vpop.permute.xlu2 %794 }
 0x1be   : > { %v591_v57 = vor.u32 1.1754944e-38, %v590_v47  ;;  %vm589_vm3 = vcmp.eq.f32.partialorder %v588_v49, 8.507059e+37 }
 0x1bf   : > { %v597_v32 = vmul.f32 %v1224_v25, %v596_v31 }
 0x1c1   : > { %v598_v34 = vadd.f32 %v1224_v25, %v597_v32 }
 0x1c2   : > { %v1226_v35 = vpop.eup %1225 }
 0x1c3   : > { %v580_v41 = vmul.f32 %v1226_v35, %v545_v30  ;;  %v602_v42 = vsel %vm601_vm13, %v1224_v25, %v598_v34  ;;  %vm585_vm15 = vweird.f32 %v1226_v35 }
 0x1c4   : > { %v607_v43 = vsel %vm604_vm14, %v606_v37, %v602_v42  ;;  %vm586_vm2 = vmor %vm584_vm0, %vm585_vm15 }
 0x1c5   : > { %v581_v44 = vsub.f32 1.0, %v580_v41  ;;  %v608_v45 = vmul.f32 %v1413_v36, %v607_v43  ;;  %v807_v25 = vpop.permute.xlu2 %806 }
 0x1c7   : > { %v582_v48 = vmul.f32 %v1226_v35, %v581_v44  ;;  %v612_v54 = vmul.f32 0.5, %v608_v45 }
 0x1c9   : > { %v583_v55 = vadd.f32 %v1226_v35, %v582_v48  ;;  %v624_v56 = vadd.f32 %v620_v46, %v612_v54 }
 0x1cb   : > { %1119 = vmatmul.msk.f32.vlgmr.msra.gmra.mxu3 %vm512_vm1, %v624_v56  ;;  %v587_v36 = vsel %vm586_vm2, %v1226_v35, %v583_v55 }
 0x1cc   : > { %v592_v59 = vsel %vm589_vm3, %v591_v57, %v587_v36 }
 0x1cd   : > { %v593_v60 = vmul.f32 %v1417_v39, %v592_v59  ;;  %v1273_v39 = vmov 1  }
 0x1ce   : > { %1199 = vset.pattern.permute.xlu1 %v1273_v39 }
 0x1cf   : > { %v611_v62 = vmul.f32 0.5, %v593_v60  ;;  %782 = vperm.xlu1 %1199, %v1454_v18   ;;  %v911_v60 = vld [vmem:[%s1653_s6 + $0x58] sm:$0xff] }
 0x1d0   : > { %1138 = vmatpush.msrb.mxu2 %v911_v60  ;;  %929 = vmatpush.msrb.mxu0 %v911_v60 }
 0x1d1   : > { %v623_v63 = vadd.f32 %v619_v61, %v611_v62  ;;  %v910_v61 = vld [vmem:[%s1653_s6 + $0x50] sm:$0xff]  ;;  %v909_v62 = vld [vmem:[%s1653_s6 + $0x48] sm:$0xff] }
 0x1d2   : > { %1139 = vmatpush.msrb.mxu2 %v910_v61  ;;  %930 = vmatpush.msrb.mxu0 %v910_v61 }
 0x1d3   : > { %1118 = vmatmul.msk.f32.gmra.mxu2 %vm512_vm1, %v623_v63 }
 0x1d4   : > { %1140 = vmatpush.msrb.mxu2 %v909_v62  ;;  %931 = vmatpush.msrb.mxu0 %v909_v62 }
 0x1d7   : > { %774 = vperm.xlu1 %1199, %v1465_v27  }
 0x1df   : > { %786 = vperm.xlu1 %1199, %v1477_v40  }
 0x1e7   : > { %1202 = vset.pattern.permute.xlu1 %v1271_v20 }
 0x1e8   : > { %826 = vperm.xlu1 %1202, %v1477_v40  }
 0x1f0   : > { %1203 = vset.pattern.permute.xlu1 %v1273_v39  ;;  %v902_v39 = vld [vmem:[%s1653_s6 + $0x10] sm:$0xff] }
 0x236   : > { %v654_v0 = vpop.f32.mrf.mxu2 }
 0x237   : > { %707 = vrot.lane.b32.xlu2 %v654_v0, %s1272_s23 }
 0x23e   : > { %v657_v1 = vpop.f32.mrf.mxu2 }
 0x23f   : > { %709 = vrot.lane.b32.xlu0 %v657_v1, %s1272_s23 }
 0x241   : > { %v783_v19 = vpop.permute.xlu1 %782 }
 0x249   : > { %v775_v22 = vpop.permute.xlu1 %774 }
 0x24e   : > { %v663_v2 = vpop.f32.mrf.mxu3 }
 0x24f   : > { %678 = vmatpush.msrb.mxu3 %v663_v2 }
 0x251   : > { %v787_v24 = vpop.permute.xlu1 %786 }
 0x256   : > { %v660_v3 = vpop.f32.mrf.mxu2 }
 0x257   : > { %711 = vrot.lane.b32.xlu2 %v660_v3, %s1272_s23  ;;  %679 = vmatpush.msrb.mxu3 %v660_v3  ;;  %v903_v3 = vld [vmem:[%s1653_s6 + $0x18] sm:$0xff] }
 0x259   : > { %680 = vmatpush.msrb.mxu3 %v657_v1  ;;  %v905_v1 = vld [vmem:[%s1653_s6 + $0x28] sm:$0xff] }
 0x25b   : > { %681 = vmatpush.msrb.mxu3 %v654_v0  ;;  %v906_v0 = vld [vmem:[%s1653_s6 + $0x30] sm:$0xff] }
 0x25c   : > { %1120 = vmatmul.msk.f32.vlgmr.msrb.gmra.mxu3 %vm512_vm1, %v1444_v13 }
 0x25f   : > { %713 = vrot.lane.b32.xlu2 %v663_v2, %s1272_s23  ;;  %v904_v2 = vld [vmem:[%s1653_s6 + $0x20] sm:$0xff] }
 0x264   : > { %1121 = vmatmul.msk.f32.gmra.mxu3 %vm512_vm1, %v1460_v26  ;;  %v827_v26 = vpop.permute.xlu1 %826 }
 0x26c   : > { %1122 = vmatmul.msk.f32.gmra.mxu3 %vm512_vm1, %v623_v63  ;;  %v907_v63 = vld [vmem:[%s1653_s6 + $0x38] sm:$0xff] }
 0x274   : > { %1123 = vmatmul.msk.f32.gmra.mxu3 %vm512_vm1, %v624_v56  ;;  %vm735_vm1 = vcmask 64512  }
 0x291   : > { %v708_v28 = vpop.permute.xlu2 %707 }
 0x292   : > { %v736_v31 = vsel %vm735_vm1, %v1432_v53, %v708_v28 }
 0x2b1   : > { %v712_v34 = vpop.permute.xlu2 %711 }
 0x2b9   : > { %v714_v37 = vpop.permute.xlu2 %713 }
 0x2ba   : > { %v739_v46 = vsel %vm735_vm1, %v1426_v51, %v714_v37 }
 0x2df   : > { %v683_v4 = vpop.f32.mrf.mxu3 }
 0x2e0   : > { %v695_v5 = vmul.f32 2.0, %v683_v4  ;;  %v901_v4 = vld [vmem:[%s1653_s6 + $0x8] sm:$0xff] }
 0x2e2   : > { %v699_v6 = vsub.f32 %v695_v5, %v1432_v53  ;;  %v738_v53 = vsel %vm735_vm1, %v1424_v50, %v712_v34  ;;  %v900_v5 = vld [vmem:[%s1653_s6] sm:$0xff] }
 0x2e4   : > { %723 = vrot.lane.b32.xlu1 %v699_v6, %s1274_s24 }
 0x2e7   : > { %v686_v7 = vpop.f32.mrf.mxu3 }
 0x2e8   : > { %v696_v8 = vmul.f32 2.0, %v686_v7 }
 0x2ea   : > { %v700_v10 = vsub.f32 %v696_v8, %v1428_v52 }
 0x2ec   : > { %778 = vperm.xlu1 %1203, %v1503_v9   ;;  %725 = vrot.lane.b32.xlu2 %v700_v10, %s1274_s24 }
 0x2ef   : > { %v689_v11 = vpop.f32.mrf.mxu3 }
 0x2f0   : > { %v697_v12 = vmul.f32 2.0, %v689_v11 }
 0x2f2   : > { %v701_v13 = vsub.f32 %v697_v12, %v1424_v50 }
 0x2f4   : > { %1206 = vset.pattern.permute.xlu1 %v1275_v14  ;;  %818 = vperm.xlu2 %1205, %v1503_v9  }
 0x2f5   : > { %727 = vrot.lane.b32.xlu0 %v701_v13, %s1274_s24  ;;  %761 = vperm.xlu1 %1206, %v1454_v18   ;;  %v823_v18 = vpop.permute.xlu0 %822 }
 0x2f7   : > { %v692_v15 = vpop.f32.mrf.mxu3 }
 0x2f8   : > { %v698_v16 = vmul.f32 2.0, %v692_v15 }
 0x2fa   : > { %v702_v17 = vsub.f32 %v698_v16, %v1426_v51 }
 0x2fc   : > { %1207 = vset.pattern.permute.xlu2 %v1275_v14 }
 0x2fd   : > { %729 = vrot.lane.b32.xlu0 %v702_v17, %s1274_s24  ;;  %766 = vperm.xlu1 %1206, %v1477_v40   ;;  %v815_v30 = vpop.permute.xlu0 %814 }
 0x2fe   : > { %751 = vperm.xlu2 %1207, %v1465_v27  }
 0x305   : > { %798 = vperm.xlu0 %1204, %v1503_v9   ;;  %v710_v35 = vpop.permute.xlu0 %709 }
 0x306   : > { %v737_v50 = vsel %vm735_vm1, %v1428_v52, %v710_v35 }
 0x30d   : > { %1208 = vset.pattern.permute.xlu0 %v1275_v14 }
 0x346   : > { %v726_v44 = vpop.permute.xlu2 %725 }
 0x347   : > { %v1536_v48 = vsel %vm740_vm4, %v737_v50, %v726_v44  ;;  %v899_v50 = vld [vmem:[%s1654_s7 + $0x18] sm:$0xff] }
 0x34e   : > { %v819_v57 = vpop.permute.xlu2 %818 }
 0x34f   : > { %v830_v36 = vmul.f32 %v819_v57, %v1536_v48 }
 0x356   : > { %v724_v29 = vpop.permute.xlu1 %723 }
 0x357   : > { %v1517_v27 = vsel %vm740_vm4, %v736_v31, %v724_v29 }
 0x358   : > { %v809_v32 = vmul.f32 %v795_v23, %v1517_v27  ;;  %v789_v33 = vmul.f32 %v775_v22, %v1517_v27  ;;  %v829_v56 = vmul.f32 %v815_v30, %v1517_v27  ;;  %v752_v6 = vpop.permute.xlu2 %751 }
 0x35a   : > { %853 = vrot.lane.b32.xlu2 %v809_v32, %s1276_s27  ;;  %837 = vrot.lane.b32.xlu0 %v789_v33, %s1277_s28 }
 0x35e   : > { %v779_v45 = vpop.permute.xlu1 %778 }
 0x35f   : > { %v790_v54 = vmul.f32 %v779_v45, %v1536_v48 }
 0x367   : > { %v728_v38 = vpop.permute.xlu0 %727  ;;  %v762_v7 = vpop.permute.xlu1 %761 }
 0x368   : > { %v1525_v40 = vsel %vm740_vm4, %v738_v53, %v728_v38 }
 0x369   : > { %v811_v41 = vmul.f32 %v803_v21, %v1525_v40  ;;  %v791_v42 = vmul.f32 %v783_v19, %v1525_v40  ;;  %v831_v43 = vmul.f32 %v823_v18, %v1525_v40  ;;  %v771_v12 = vmul.f32 %v762_v7, %v1525_v40  ;;  %v898_v40 = vld [vmem:[%s1654_s7 + $0x10] sm:$0xff] }
 0x36a   : > { %v769_v19 = vmul.f32 %v752_v6, %v1517_v27 }
 0x36b   : > { %857 = vrot.lane.b32.xlu1 %v811_v41, %s1276_s27  ;;  %841 = vrot.lane.b32.xlu2 %v791_v42, %s1277_s28  ;;  %v896_v42 = vld [vmem:[%s1654_s7] sm:$0xff] }
 0x36c   : > { %873 = vrot.lane.b32.xlu0 %v831_v43, %s1278_s29 }
 0x36f   : > { %v730_v47 = vpop.permute.xlu0 %729 }
 0x370   : > { %v1539_v49 = vsel %vm740_vm4, %v739_v46, %v730_v47 }
 0x371   : > { %v792_v55 = vmul.f32 %v787_v24, %v1539_v49  ;;  %v812_v52 = vmul.f32 %v807_v25, %v1539_v49  ;;  %v832_v51 = vmul.f32 %v827_v26, %v1539_v49 }
 0x373   : > { %839 = vrot.lane.b32.xlu2 %v790_v54, %s1277_s28  ;;  %843 = vrot.lane.b32.xlu1 %v792_v55, %s1277_s28 }
 0x374   : > { %869 = vrot.lane.b32.xlu0 %v829_v56, %s1278_s29 }
 0x377   : > { %v799_v58 = vpop.permute.xlu0 %798 }
 0x378   : > { %v810_v59 = vmul.f32 %v799_v58, %v1536_v48 }
 0x37b   : > { %859 = vrot.lane.b32.xlu2 %v812_v52, %s1276_s27  ;;  %875 = vrot.lane.b32.xlu1 %v832_v51, %s1278_s29 }
 0x37c   : > { %756 = vperm.xlu0 %1208, %v1503_v9   ;;  %v767_v9 = vpop.permute.xlu1 %766 }
 0x37d   : > { %v772_v26 = vmul.f32 %v767_v9, %v1539_v49 }
 0x383   : > { %871 = vrot.lane.b32.xlu2 %v830_v36, %s1278_s29  ;;  %855 = vrot.lane.b32.xlu1 %v810_v59, %s1276_s27 }
 0x384   : > { %1209 = vset.pattern.permute.xlu0 %v1271_v20  ;;  %v908_v20 = vld [vmem:[%s1653_s6 + $0x40] sm:$0xff] }
 0x385   : > { %1141 = vmatpush.msrb.mxu2 %v908_v20  ;;  %932 = vmatpush.msrb.mxu0 %v908_v20 }
 0x387   : > { %1142 = vmatpush.msrb.mxu2 %v907_v63  ;;  %933 = vmatpush.msrb.mxu0 %v907_v63 }
 0x389   : > { %1143 = vmatpush.msrb.mxu2 %v906_v0  ;;  %934 = vmatpush.msrb.mxu0 %v906_v0 }
 0x38b   : > { %1144 = vmatpush.msrb.mxu2 %v905_v1  ;;  %935 = vmatpush.msrb.mxu0 %v905_v1 }
 0x38d   : > { %1145 = vmatpush.msrb.mxu2 %v904_v2  ;;  %936 = vmatpush.msrb.mxu0 %v904_v2 }
 0x38f   : > { %1146 = vmatpush.msrb.mxu2 %v903_v3  ;;  %937 = vmatpush.msrb.mxu0 %v903_v3 }
 0x391   : > { %1147 = vmatpush.msrb.mxu2 %v902_v39  ;;  %938 = vmatpush.msrb.mxu0 %v902_v39 }
 0x393   : > { %1148 = vmatpush.msrb.mxu2 %v901_v4  ;;  %939 = vmatpush.msrb.mxu0 %v901_v4 }
 0x395   : > { %1149 = vmatpush.msrb.mxu2 %v900_v5  ;;  %940 = vmatpush.msrb.mxu0 %v900_v5 }
 0x3b4   : > { %v854_v8 = vpop.permute.xlu2 %853 }
 0x3c5   : > { %v842_v11 = vpop.permute.xlu2 %841 }
 0x3c6   : > { %v884_v13 = vsel %vm881_vm5, %v771_v12, %v842_v11 }
 0x3cc   : > { %v838_v10 = vpop.permute.xlu0 %837 }
 0x3cd   : > { %v840_v21 = vpop.permute.xlu2 %839  ;;  %v882_v22 = vsel %vm881_vm5, %v769_v19, %v838_v10 }
 0x3ce   : > { %v887_v24 = vsel %vm886_vm7, %v882_v22, %v854_v8 }
 0x3d5   : > { %v860_v30 = vpop.permute.xlu2 %859 }
 0x3dd   : > { %v858_v14 = vpop.permute.xlu1 %857  ;;  %v872_v37 = vpop.permute.xlu2 %871 }
 0x3de   : > { %v889_v15 = vsel %vm886_vm7, %v884_v13, %v858_v14  ;;  %v874_v16 = vpop.permute.xlu0 %873 }
 0x3df   : > { %v894_v17 = vsel %vm891_vm6, %v889_v15, %v874_v16 }
 0x3e0   : > { %1126 = vmatmul.msk.f32.vlgmr.msrb.gmra.mxu2 %vm912_vm8, %v894_v17 }
 0x3e5   : > { %v844_v23 = vpop.permute.xlu1 %843 }
 0x3e6   : > { %v870_v25 = vpop.permute.xlu0 %869  ;;  %v885_v28 = vsel %vm881_vm5, %v772_v26, %v844_v23 }
 0x3e7   : > { %v892_v18 = vsel %vm891_vm6, %v887_v24, %v870_v25  ;;  %v890_v29 = vsel %vm886_vm7, %v885_v28, %v860_v30 }
 0x3e8   : > { %1124 = vmatmul.msk.f32.vlgmr.msrb.gmra.mxu0 %vm912_vm8, %v892_v18 }
 0x3ed   : > { %v876_v31 = vpop.permute.xlu1 %875 }
 0x3ee   : > { %v757_v27 = vpop.permute.xlu0 %756  ;;  %v895_v32 = vsel %vm891_vm6, %v890_v29, %v876_v31 }
 0x3ef   : > { %1127 = vmatmul.msk.f32.gmra.mxu2 %vm912_vm8, %v895_v32  ;;  %v770_v33 = vmul.f32 %v757_v27, %v1536_v48  ;;  %v897_v48 = vld [vmem:[%s1654_s7 + $0x8] sm:$0xff] }
 0x3f1   : > { %v883_v35 = vsel %vm881_vm5, %v770_v33, %v840_v21 }
 0x3f5   : > { %v856_v34 = vpop.permute.xlu1 %855 }
 0x3f6   : > { %v888_v53 = vsel %vm886_vm7, %v883_v35, %v856_v34 }
 0x3f7   : > { %v893_v38 = vsel %vm891_vm6, %v888_v53, %v872_v37 }
 0x3f8   : > { %1125 = vmatmul.msk.f32.gmra.mxu0 %vm912_vm8, %v893_v38 }
 0x463   : > { %v948_v41 = vpop.f32.mrf.mxu2 }
 0x464   : > { %v956_v43 = vadd.f32 %v948_v41, %v898_v40 }
 0x465   : > { %v942_v44 = vpop.f32.mrf.mxu0 }
 0x466   : > { %960 = vst.msk [vmem:[#allocation2 + $0x10] sm:$0xff] %vm735_vm1, %v956_v43  ;;  %v954_v45 = vadd.f32 %v942_v44, %v896_v42 }
 0x468   : > { %958 = vst.msk [vmem:[#allocation2] sm:$0xff] %vm735_vm1, %v954_v45 }
 0x472   : > { %v951_v46 = vpop.f32.mrf.mxu2 }
 0x473   : > { %v957_v47 = vadd.f32 %v951_v46, %v899_v50 }
 0x475   : > { %961 = vst.msk [vmem:[#allocation2 + $0x18] sm:$0xff] %vm735_vm1, %v957_v47  ;;  %v945_v49 = vpop.f32.mrf.mxu0 }
 0x476   : > { %v955_v54 = vadd.f32 %v945_v49, %v897_v48 }
 0x478   : > { %959 = vst.msk [vmem:[#allocation2 + $0x8] sm:$0xff] %vm735_vm1, %v955_v54 }
 0x479 PF: > { %v965_v55 = vld [vmem:[%s1655_s8] sm:$0xff]  ;;  %s1128_s22 = sshll.u32 %s1252_s13, 3  ;;  %vm970_vm9 = vcmask 64512   ;;  %vm995_vm10 = vcmask 130048  }
 0x47a   : > { %989 = vmatpush.msra.mxu0 %v965_v55  ;;  %s963_s23 = scalar_lea.vmem [#allocation2], %s1128_s22  ;;  %v1227_v52 = vld [vmem:[%s1656_s9] ss:$0 sm:$0xff] }
 0x47f   : > { %v964_v56 = vld [vmem:[%s963_s23] sm:$0xff] }
 0x480   : > { %1129 = vmatmul.msk.f32.vlgmr.msra.gmra.mxu0 %vm970_vm9, %v964_v56 }
 0x4fd   : > { %v991_v51 = vpop.f32.mrf.mxu0 }
 0x4fe   : > { %v992_v57 = vadd.f32 %v1227_v52, %v991_v51 }
 0x500   : > { %1228 = vtanh.f32 %v992_v57 }
 0x506   : > { %v1229_v58 = vpop.eup %1228 }
 0x507   : > { %996 = vst.msk [vmem:[%s1379_s19] sm:$0xff] %vm995_vm10, %v1229_v58 }
 0x508 PF: > { %s20_s17 = sadd.s32 1, %s1268_s17   ;;  %s1659_s26 = sld [smem:[#allocation3_spill]] }
 0x509   : > { %p17_p8 = scmp.ge.s32.totalorder %s20_s17, 10   ;;  %s1660_s13 = smov %s1260_s15 }
 0x50a   : > { %s1661_s14 = smov %s1264_s16  ;;  %s1662_s15 = smov %s1665_s18 }
 0x50b   :  { %19 = sbr.rel (!%p17_p8) target bundleno = 3 (0x3), region = 98 }
 0x50e   : > { %s1663_s16 = smov %s1659_s26 }

</bundles_post_ra>
